<compile_context>
chip_gen: v6e
topology: v6e:2x2x1
jax: 0.10.0
libtpu: 0.0.40
codegen_flags: <defaults>
</compile_context>

<pallas_src>
import jax
import jax.numpy as jnp
from jax.experimental import pallas as pl
from jax.experimental.pallas import tpu as pltpu  # noqa: F401  (TPU backend)

# ---------------------------------------------------------------------------
# Model configuration (mirrors the args used by the PyTorch module)
# ---------------------------------------------------------------------------
INITIAL_SIZE = 8
KER_SIZE = 3
NUM_CNN_BLOCKS = 2
LAYERS_PER_BLOCK = 2
IMAGE_EMBEDDING = 32
BN_EPS = 1e-5


# ---------------------------------------------------------------------------
# Pallas kernels (single full-size block; M = B*Ho*Wo is a multiple of 128)
# ---------------------------------------------------------------------------
def _conv_bias_kernel(w_ref, p_ref, b_ref, y_ref):
    # y = W @ patches + b   (bf16 x bf16 -> f32 accumulate on the MXU)
    acc = jnp.dot(w_ref[...], p_ref[...], preferred_element_type=jnp.float32)
    y_ref[...] = acc + b_ref[...]


def _conv_bias_next_bn_relu_kernel(w_ref, p_ref, b_ref, g_ref, bt_ref,
                                   y_ref, z_ref):
    # Conv output (feature map, f32) PLUS the next layer's BatchNorm
    # (training batch statistics, biased variance) + ReLU fused in the
    # epilogue, emitted as a bf16 activation for the next layer's patches.
    acc = jnp.dot(w_ref[...], p_ref[...], preferred_element_type=jnp.float32)
    y = acc + b_ref[...]
    y_ref[...] = y
    m = jnp.mean(y, axis=1, keepdims=True)                   # lane-axis reduce
    v = jnp.mean((y - m) * (y - m), axis=1, keepdims=True)   # biased variance
    a = g_ref[...] * jax.lax.rsqrt(v + BN_EPS)
    d = bt_ref[...] - m * a
    z_ref[...] = jnp.maximum(y * a + d, 0.0).astype(z_ref.dtype)


# ---------------------------------------------------------------------------
# Pallas wrappers (whole arrays as single blocks — peak VMEM use is < 1 MiB)
# ---------------------------------------------------------------------------
def conv_layer(w_bf16, patches_bf16, bias_col):
    cout, _ = w_bf16.shape
    _, m = patches_bf16.shape
    return pl.pallas_call(
        _conv_bias_kernel,
        out_shape=jax.ShapeDtypeStruct((cout, m), jnp.float32),
    )(w_bf16, patches_bf16, bias_col)


def conv_layer_fused_next_bn(w_bf16, patches_bf16, bias_col,
                             next_gamma_col, next_beta_col):
    cout, _ = w_bf16.shape
    _, m = patches_bf16.shape
    return pl.pallas_call(
        _conv_bias_next_bn_relu_kernel,
        out_shape=(jax.ShapeDtypeStruct((cout, m), jnp.float32),
                   jax.ShapeDtypeStruct((cout, m), jnp.bfloat16)),
    )(w_bf16, patches_bf16, bias_col, next_gamma_col, next_beta_col)


# ---------------------------------------------------------------------------
# im2col^T glue (channels-first, lane-dense M axis, zero padding)
# ---------------------------------------------------------------------------
def _extract_patches(x4, stride):
    """x4:(C,B,H,W) -> patches^T (9*C, B*Ho*Wo); rows tap-major / channel-minor.

    # TODO(synk): 9-tap zero-pad/slice/concat stays in XLA glue; building the
    # taps fully in-kernel would need strided minor-dim views Mosaic rejects.
    """
    C, B, H, W = x4.shape
    Ho = (H + 2 - KER_SIZE) // stride + 1
    Wo = (W + 2 - KER_SIZE) // stride + 1
    xp = jnp.pad(x4, ((0, 0), (0, 0), (1, 1), (1, 1)))
    taps = []
    for di in range(KER_SIZE):
        for dj in range(KER_SIZE):
            taps.append(
                xp[:, :, di:di + stride * Ho:stride, dj:dj + stride * Wo:stride]
                .reshape(C, B * Ho * Wo))
    return jnp.concatenate(taps, axis=0), Ho, Wo


# ---------------------------------------------------------------------------
# grid_sample (bilinear, align_corners=True, zero padding) — matches the
# reference's F.grid_sample(..., align_corners=True).
# TODO(synk): data-dependent bilinear gather kept in plain JAX (no clean tiled
#             Pallas form for arbitrary scattered coordinates).
# ---------------------------------------------------------------------------
def grid_sample_nhwc(feat, gx, gy):
    """feat:(B,H,W,C); gx,gy:(B,Nv) normalized grid coords -> (B,Nv,C)."""
    B, H, W, C = feat.shape
    ix = (gx + 1.0) * 0.5 * (W - 1)
    iy = (gy + 1.0) * 0.5 * (H - 1)
    ix0 = jnp.floor(ix)
    iy0 = jnp.floor(iy)
    wx1 = ix - ix0
    wx0 = 1.0 - wx1
    wy1 = iy - iy0
    wy0 = 1.0 - wy1

    def gather(fb, yy, xx):
        valid = ((yy >= 0) & (yy < H) & (xx >= 0) & (xx < W)).astype(fb.dtype)
        yc = jnp.clip(yy, 0, H - 1)
        xc = jnp.clip(xx, 0, W - 1)
        return fb[yc, xc] * valid[:, None]

    def sample_b(fb, ix0b, iy0b, wx0b, wx1b, wy0b, wy1b):
        x0 = ix0b.astype(jnp.int32)
        x1 = x0 + 1
        y0 = iy0b.astype(jnp.int32)
        y1 = y0 + 1
        v00 = gather(fb, y0, x0)
        v01 = gather(fb, y0, x1)
        v10 = gather(fb, y1, x0)
        v11 = gather(fb, y1, x1)
        return (v00 * (wy0b * wx0b)[:, None] + v01 * (wy0b * wx1b)[:, None]
                + v10 * (wy1b * wx0b)[:, None] + v11 * (wy1b * wx1b)[:, None])

    return jax.vmap(sample_b)(feat, ix0, iy0, wx0, wx1, wy0, wy1)


# ---------------------------------------------------------------------------
# Model configuration / parameters (deterministic synthetic init)
# ---------------------------------------------------------------------------
def build_specs():
    specs = [dict(simple=True, cin=3, cout=3, stride=1)]
    cur, nxt = 3, INITIAL_SIZE
    for _ in range(NUM_CNN_BLOCKS):
        specs.append(dict(simple=False, cin=cur, cout=nxt, stride=2))
        cur, nxt = nxt, nxt * 2
        for _ in range(LAYERS_PER_BLOCK - 1):
            specs.append(dict(simple=False, cin=cur, cout=cur, stride=1))
    return specs


def features_size(specs):
    # mirrors __init__: probe with a 128x128 image; with k=3 every layer runs.
    n_layers = len(specs)
    selections = [n_layers - 1 - (i + 1) * LAYERS_PER_BLOCK for i in range(3)]
    size = 0
    spatial = 128
    last_c = 3
    for e, s in enumerate(specs):
        if spatial < KER_SIZE:
            break
        spatial = (spatial + 2 - KER_SIZE) // s["stride"] + 1
        last_c = s["cout"]
        if e in selections:
            size += s["cout"]
    return size + last_c


def init_params(key, specs):
    params = {"layers": []}
    for s in specs:
        key, kw, kb = jax.random.split(key, 3)
        lp = {
            "w": 0.1 * jax.random.normal(
                kw, (s["cout"], s["cin"], KER_SIZE, KER_SIZE), jnp.float32),
            "b": 0.1 * jax.random.normal(kb, (s["cout"],), jnp.float32),
        }
        if not s["simple"]:
            lp["gamma"] = jnp.ones((s["cin"],), jnp.float32)
            lp["beta"] = jnp.zeros((s["cin"],), jnp.float32)
        params["layers"].append(lp)
    fs = features_size(specs)
    key, kw, kb = jax.random.split(key, 3)
    params["fc_w"] = 0.1 * jax.random.normal(kw, (IMAGE_EMBEDDING, fs), jnp.float32)
    params["fc_b"] = 0.1 * jax.random.normal(kb, (IMAGE_EMBEDDING,), jnp.float32)
    return params


def prepare_params(params, specs):
    """One-time layout prep: all reshapes/transposes/casts hoisted out of fwd."""
    prep = {"layers": []}
    for s, lp in zip(specs, params["layers"]):
        # (Cout, Cin, kh, kw) -> (Cout, kh*kw*Cin): columns tap-major /
        # channel-minor, matching _extract_patches row order.  bf16 for the MXU.
        w_mat = jnp.transpose(lp["w"], (0, 2, 3, 1)).reshape(
            s["cout"], KER_SIZE * KER_SIZE * s["cin"]).astype(jnp.bfloat16)
        entry = {"w_mat": w_mat, "b_col": lp["b"].reshape(-1, 1)}
        if not s["simple"]:
            entry["gamma_col"] = lp["gamma"].reshape(-1, 1)
            entry["beta_col"] = lp["beta"].reshape(-1, 1)
        prep["layers"].append(entry)
    prep["fc_w"] = params["fc_w"]          # (E, F)
    prep["fc_b"] = params["fc_b"]          # (E,)
    return prep


# ---------------------------------------------------------------------------
# Forward pass (matches Image_Encoder.forward; BN in training mode)
# ---------------------------------------------------------------------------
def image_encoder_forward(prep, specs, img_nchw, points, matricies):
    # channels-first (C, B, H, W): channels on sublanes, batch*spatial on lanes.
    x = jnp.transpose(img_nchw, (1, 0, 2, 3)).astype(jnp.bfloat16)
    n_layers = len(specs)
    selections = [n_layers - 1 - (i + 1) * LAYERS_PER_BLOCK for i in range(3)]

    feats = []
    last = x
    for e, spec in enumerate(specs):
        _, B, _, W = x.shape
        if W < KER_SIZE:                      # == `x.shape[-1] < ker_size`
            break
        lp = prep["layers"][e]
        patches, Ho, Wo = _extract_patches(x, spec["stride"])
        next_runs = (e + 1 < n_layers) and (Wo >= KER_SIZE)
        if next_runs and not specs[e + 1]["simple"]:
            # Fused: conv + bias, then the NEXT layer's BN(batch stats)+ReLU
            # applied once to the conv output (its gamma/beta have length
            # cin_{e+1} == cout_e), emitted as the next layer's bf16 input.
            nxt = prep["layers"][e + 1]
            y, z = conv_layer_fused_next_bn(lp["w_mat"], patches, lp["b_col"],
                                            nxt["gamma_col"], nxt["beta_col"])
            x = z.reshape(spec["cout"], B, Ho, Wo)
        else:
            y = conv_layer(lp["w_mat"], patches, lp["b_col"])
            x = y.astype(jnp.bfloat16).reshape(spec["cout"], B, Ho, Wo)
        y4 = y.reshape(spec["cout"], B, Ho, Wo)
        if e in selections:
            feats.append(y4)
        last = y4
    feats.append(last)

    # ---- pooling: vertex projection + bilinear grid_sample (plain JAX) ----
    B = points.shape[0]
    Nv = points.shape[1]
    ones = jnp.ones((B, Nv, 1), jnp.float32)
    ext = jnp.concatenate([points, ones], axis=-1)                 # (B, Nv, 4)
    ext = jnp.einsum("bnk,bjk->bnj", ext, matricies)               # bmm w/ mat^T
    z = ext[:, :, 2]
    z = jnp.where(z == 0.0, 0.1, z)
    xs = ext[:, :, 1] / z / 128.0
    xs = jnp.where(jnp.isinf(xs), 0.5, xs)
    ys = ext[:, :, 0] / z / 128.0
    ys = jnp.where(jnp.isinf(ys), 0.5, ys)
    xs = xs * 0.5
    ys = ys * 0.5
    gx = ys * 2.0 - 1.0   # grid[..., 0]  (width coordinate)
    gy = xs * 2.0 - 1.0   # grid[..., 1]  (height coordinate)

    sampled = []
    for f in feats:
        f_nhwc = jnp.transpose(f, (1, 2, 3, 0)).astype(jnp.float32)  # (B,H,W,C)
        sampled.append(grid_sample_nhwc(f_nhwc, gx, gy))             # (B,Nv,C)
    full = jnp.concatenate(sampled, axis=-1)                          # (B,Nv,F)

    # ---- final fc: (32 x 27) — far below dispatch cost, plain XLA einsum ----
    return jnp.einsum("bnf,ef->bne", full, prep["fc_w"]) + prep["fc_b"]


# ---------------------------------------------------------------------------
if __name__ == "__main__":
    specs = build_specs()
    params = init_params(jax.random.PRNGKey(42), specs)
    prep = prepare_params(params, specs)

    key = jax.random.PRNGKey(0)
    k_img, k_pts, k_mat = jax.random.split(key, 3)
    img = jax.random.normal(k_img, (2, 3, 32, 32), jnp.float32)          # NCHW
    points = jax.random.normal(k_pts, (2, 16, 3), jnp.float32)           # (B, Nv, 3)
    matricies = jax.random.normal(k_mat, (2, 3, 4), jnp.float32)         # (B, 3, 4)

    fwd = jax.jit(lambda p, im, pts, mats: image_encoder_forward(p, specs, im, pts, mats))
    out = fwd(prep, img, points, matricies)
    jax.block_until_ready(out)
    assert out.shape == (2, 16, IMAGE_EMBEDDING)
    print("KERNEL_OK")
</pallas_src>

<mosaic_0001>
module attributes {stable_mosaic.version = 11 : i64} {
  func.func @_conv_bias_next_bn_relu_kernel(%arg0: memref<3x27xbf16, #tpu.memory_space<vmem>>, %arg1: memref<27x2048xbf16, #tpu.memory_space<vmem>>, %arg2: memref<3x1xf32, #tpu.memory_space<vmem>>, %arg3: memref<3x1xf32, #tpu.memory_space<vmem>>, %arg4: memref<3x1xf32, #tpu.memory_space<vmem>>, %arg5: memref<3x2048xf32, #tpu.memory_space<vmem>>, %arg6: memref<3x2048xbf16, #tpu.memory_space<vmem>>) attributes {dimension_semantics = [], scalar_prefetch = 0 : i64, scratch_operands = 0 : i64, tpu.core_type = #tpu.core_type<tc>} {
    %c0 = arith.constant 0 : index
    %c0_0 = arith.constant 0 : index
    %0 = vector.load %arg0[%c0, %c0_0] : memref<3x27xbf16, #tpu.memory_space<vmem>>, vector<3x27xbf16>
    %c0_1 = arith.constant 0 : index
    %c0_2 = arith.constant 0 : index
    %1 = vector.load %arg1[%c0_1, %c0_2] : memref<27x2048xbf16, #tpu.memory_space<vmem>>, vector<27x2048xbf16>
    %cst = arith.constant dense<0.000000e+00> : vector<3x2048xf32>
    %2 = tpu.matmul %0, %1, %cst {dimension_numbers = #tpu.dot_dimension_numbers<[1], [0], [0], [1], [0, 0, 1, 1], [], []>} : vector<3x27xbf16>, vector<27x2048xbf16>, vector<3x2048xf32> -> vector<3x2048xf32>
    %c0_3 = arith.constant 0 : index
    %c0_4 = arith.constant 0 : index
    %3 = vector.load %arg2[%c0_3, %c0_4] : memref<3x1xf32, #tpu.memory_space<vmem>>, vector<3x1xf32>
    %4 = vector.broadcast %3 : vector<3x1xf32> to vector<3x2048xf32>
    %5 = arith.addf %2, %4 : vector<3x2048xf32>
    %c0_5 = arith.constant 0 : index
    %c0_6 = arith.constant 0 : index
    %6 = vector.load %arg5[%c0_5, %c0_6] : memref<3x2048xf32, #tpu.memory_space<vmem>>, vector<3x2048xf32>
    tpu.vector_store %arg5[%c0_5, %c0_6], %5 {strides = array<i32>} : memref<3x2048xf32, #tpu.memory_space<vmem>>, vector<3x2048xf32>,
    %cst_7 = arith.constant dense<0.000000e+00> : vector<3xf32>
    %7 = vector.multi_reduction <add>, %5, %cst_7 [1] : vector<3x2048xf32> to vector<3xf32>
    %8 = vector.shape_cast %7 : vector<3xf32> to vector<3x1xf32>
    %cst_8 = arith.constant 2.048000e+03 : f32
    %9 = vector.broadcast %cst_8 : f32 to vector<3x1xf32>
    %10 = arith.divf %8, %9 : vector<3x1xf32>
    %11 = vector.broadcast %10 : vector<3x1xf32> to vector<3x2048xf32>
    %12 = arith.subf %5, %11 : vector<3x2048xf32>
    %13 = vector.broadcast %10 : vector<3x1xf32> to vector<3x2048xf32>
    %14 = arith.subf %5, %13 : vector<3x2048xf32>
    %15 = arith.mulf %12, %14 : vector<3x2048xf32>
    %cst_9 = arith.constant dense<0.000000e+00> : vector<3xf32>
    %16 = vector.multi_reduction <add>, %15, %cst_9 [1] : vector<3x2048xf32> to vector<3xf32>
    %17 = vector.shape_cast %16 : vector<3xf32> to vector<3x1xf32>
    %cst_10 = arith.constant 2.048000e+03 : f32
    %18 = vector.broadcast %cst_10 : f32 to vector<3x1xf32>
    %19 = arith.divf %17, %18 : vector<3x1xf32>
    %c0_11 = arith.constant 0 : index
    %c0_12 = arith.constant 0 : index
    %20 = vector.load %arg3[%c0_11, %c0_12] : memref<3x1xf32, #tpu.memory_space<vmem>>, vector<3x1xf32>
    %cst_13 = arith.constant 9.99999974E-6 : f32
    %21 = vector.broadcast %cst_13 : f32 to vector<3x1xf32>
    %22 = arith.addf %19, %21 : vector<3x1xf32>
    %23 = math.rsqrt %22 : vector<3x1xf32>
    %24 = arith.mulf %20, %23 : vector<3x1xf32>
    %c0_14 = arith.constant 0 : index
    %c0_15 = arith.constant 0 : index
    %25 = vector.load %arg4[%c0_14, %c0_15] : memref<3x1xf32, #tpu.memory_space<vmem>>, vector<3x1xf32>
    %26 = arith.mulf %10, %24 : vector<3x1xf32>
    %27 = arith.subf %25, %26 : vector<3x1xf32>
    %28 = vector.broadcast %24 : vector<3x1xf32> to vector<3x2048xf32>
    %29 = arith.mulf %5, %28 : vector<3x2048xf32>
    %30 = vector.broadcast %27 : vector<3x1xf32> to vector<3x2048xf32>
    %31 = arith.addf %29, %30 : vector<3x2048xf32>
    %cst_16 = arith.constant 0.000000e+00 : f32
    %32 = vector.broadcast %cst_16 : f32 to vector<3x2048xf32>
    %33 = arith.maximumf %31, %32 : vector<3x2048xf32>
    %34 = arith.truncf %33 : vector<3x2048xf32> to vector<3x2048xbf16>
    %c0_17 = arith.constant 0 : index
    %c0_18 = arith.constant 0 : index
    %35 = vector.load %arg6[%c0_17, %c0_18] : memref<3x2048xbf16, #tpu.memory_space<vmem>>, vector<3x2048xbf16>
    tpu.vector_store %arg6[%c0_17, %c0_18], %34 {strides = array<i32>} : memref<3x2048xbf16, #tpu.memory_space<vmem>>, vector<3x2048xbf16>,
    return
  }
}

module attributes {stable_mosaic.version = 11 : i64} {
  func.func @_conv_bias_next_bn_relu_kernel(%arg0: memref<8x27xbf16, #tpu.memory_space<vmem>>, %arg1: memref<27x512xbf16, #tpu.memory_space<vmem>>, %arg2: memref<8x1xf32, #tpu.memory_space<vmem>>, %arg3: memref<8x1xf32, #tpu.memory_space<vmem>>, %arg4: memref<8x1xf32, #tpu.memory_space<vmem>>, %arg5: memref<8x512xf32, #tpu.memory_space<vmem>>, %arg6: memref<8x512xbf16, #tpu.memory_space<vmem>>) attributes {dimension_semantics = [], scalar_prefetch = 0 : i64, scratch_operands = 0 : i64, tpu.core_type = #tpu.core_type<tc>} {
    %c0 = arith.constant 0 : index
    %c0_0 = arith.constant 0 : index
    %0 = vector.load %arg0[%c0, %c0_0] : memref<8x27xbf16, #tpu.memory_space<vmem>>, vector<8x27xbf16>
    %c0_1 = arith.constant 0 : index
    %c0_2 = arith.constant 0 : index
    %1 = vector.load %arg1[%c0_1, %c0_2] : memref<27x512xbf16, #tpu.memory_space<vmem>>, vector<27x512xbf16>
    %cst = arith.constant dense<0.000000e+00> : vector<8x512xf32>
    %2 = tpu.matmul %0, %1, %cst {dimension_numbers = #tpu.dot_dimension_numbers<[1], [0], [0], [1], [0, 0, 1, 1], [], []>} : vector<8x27xbf16>, vector<27x512xbf16>, vector<8x512xf32> -> vector<8x512xf32>
    %c0_3 = arith.constant 0 : index
    %c0_4 = arith.constant 0 : index
    %3 = vector.load %arg2[%c0_3, %c0_4] : memref<8x1xf32, #tpu.memory_space<vmem>>, vector<8x1xf32>
    %4 = vector.broadcast %3 : vector<8x1xf32> to vector<8x512xf32>
    %5 = arith.addf %2, %4 : vector<8x512xf32>
    %c0_5 = arith.constant 0 : index
    %c0_6 = arith.constant 0 : index
    %6 = vector.load %arg5[%c0_5, %c0_6] : memref<8x512xf32, #tpu.memory_space<vmem>>, vector<8x512xf32>
    tpu.vector_store %arg5[%c0_5, %c0_6], %5 {strides = array<i32>} : memref<8x512xf32, #tpu.memory_space<vmem>>, vector<8x512xf32>,
    %cst_7 = arith.constant dense<0.000000e+00> : vector<8xf32>
    %7 = vector.multi_reduction <add>, %5, %cst_7 [1] : vector<8x512xf32> to vector<8xf32>
    %8 = vector.shape_cast %7 : vector<8xf32> to vector<8x1xf32>
    %cst_8 = arith.constant 5.120000e+02 : f32
    %9 = vector.broadcast %cst_8 : f32 to vector<8x1xf32>
    %10 = arith.divf %8, %9 : vector<8x1xf32>
    %11 = vector.broadcast %10 : vector<8x1xf32> to vector<8x512xf32>
    %12 = arith.subf %5, %11 : vector<8x512xf32>
    %13 = vector.broadcast %10 : vector<8x1xf32> to vector<8x512xf32>
    %14 = arith.subf %5, %13 : vector<8x512xf32>
    %15 = arith.mulf %12, %14 : vector<8x512xf32>
    %cst_9 = arith.constant dense<0.000000e+00> : vector<8xf32>
    %16 = vector.multi_reduction <add>, %15, %cst_9 [1] : vector<8x512xf32> to vector<8xf32>
    %17 = vector.shape_cast %16 : vector<8xf32> to vector<8x1xf32>
    %cst_10 = arith.constant 5.120000e+02 : f32
    %18 = vector.broadcast %cst_10 : f32 to vector<8x1xf32>
    %19 = arith.divf %17, %18 : vector<8x1xf32>
    %c0_11 = arith.constant 0 : index
    %c0_12 = arith.constant 0 : index
    %20 = vector.load %arg3[%c0_11, %c0_12] : memref<8x1xf32, #tpu.memory_space<vmem>>, vector<8x1xf32>
    %cst_13 = arith.constant 9.99999974E-6 : f32
    %21 = vector.broadcast %cst_13 : f32 to vector<8x1xf32>
    %22 = arith.addf %19, %21 : vector<8x1xf32>
    %23 = math.rsqrt %22 : vector<8x1xf32>
    %24 = arith.mulf %20, %23 : vector<8x1xf32>
    %c0_14 = arith.constant 0 : index
    %c0_15 = arith.constant 0 : index
    %25 = vector.load %arg4[%c0_14, %c0_15] : memref<8x1xf32, #tpu.memory_space<vmem>>, vector<8x1xf32>
    %26 = arith.mulf %10, %24 : vector<8x1xf32>
    %27 = arith.subf %25, %26 : vector<8x1xf32>
    %28 = vector.broadcast %24 : vector<8x1xf32> to vector<8x512xf32>
    %29 = arith.mulf %5, %28 : vector<8x512xf32>
    %30 = vector.broadcast %27 : vector<8x1xf32> to vector<8x512xf32>
    %31 = arith.addf %29, %30 : vector<8x512xf32>
    %cst_16 = arith.constant 0.000000e+00 : f32
    %32 = vector.broadcast %cst_16 : f32 to vector<8x512xf32>
    %33 = arith.maximumf %31, %32 : vector<8x512xf32>
    %34 = arith.truncf %33 : vector<8x512xf32> to vector<8x512xbf16>
    %c0_17 = arith.constant 0 : index
    %c0_18 = arith.constant 0 : index
    %35 = vector.load %arg6[%c0_17, %c0_18] : memref<8x512xbf16, #tpu.memory_space<vmem>>, vector<8x512xbf16>
    tpu.vector_store %arg6[%c0_17, %c0_18], %34 {strides = array<i32>} : memref<8x512xbf16, #tpu.memory_space<vmem>>, vector<8x512xbf16>,
    return
  }
}

module attributes {stable_mosaic.version = 11 : i64} {
  func.func @_conv_bias_next_bn_relu_kernel(%arg0: memref<8x72xbf16, #tpu.memory_space<vmem>>, %arg1: memref<72x512xbf16, #tpu.memory_space<vmem>>, %arg2: memref<8x1xf32, #tpu.memory_space<vmem>>, %arg3: memref<8x1xf32, #tpu.memory_space<vmem>>, %arg4: memref<8x1xf32, #tpu.memory_space<vmem>>, %arg5: memref<8x512xf32, #tpu.memory_space<vmem>>, %arg6: memref<8x512xbf16, #tpu.memory_space<vmem>>) attributes {dimension_semantics = [], scalar_prefetch = 0 : i64, scratch_operands = 0 : i64, tpu.core_type = #tpu.core_type<tc>} {
    %c0 = arith.constant 0 : index
    %c0_0 = arith.constant 0 : index
    %0 = vector.load %arg0[%c0, %c0_0] : memref<8x72xbf16, #tpu.memory_space<vmem>>, vector<8x72xbf16>
    %c0_1 = arith.constant 0 : index
    %c0_2 = arith.constant 0 : index
    %1 = vector.load %arg1[%c0_1, %c0_2] : memref<72x512xbf16, #tpu.memory_space<vmem>>, vector<72x512xbf16>
    %cst = arith.constant dense<0.000000e+00> : vector<8x512xf32>
    %2 = tpu.matmul %0, %1, %cst {dimension_numbers = #tpu.dot_dimension_numbers<[1], [0], [0], [1], [0, 0, 1, 1], [], []>} : vector<8x72xbf16>, vector<72x512xbf16>, vector<8x512xf32> -> vector<8x512xf32>
    %c0_3 = arith.constant 0 : index
    %c0_4 = arith.constant 0 : index
    %3 = vector.load %arg2[%c0_3, %c0_4] : memref<8x1xf32, #tpu.memory_space<vmem>>, vector<8x1xf32>
    %4 = vector.broadcast %3 : vector<8x1xf32> to vector<8x512xf32>
    %5 = arith.addf %2, %4 : vector<8x512xf32>
    %c0_5 = arith.constant 0 : index
    %c0_6 = arith.constant 0 : index
    %6 = vector.load %arg5[%c0_5, %c0_6] : memref<8x512xf32, #tpu.memory_space<vmem>>, vector<8x512xf32>
    tpu.vector_store %arg5[%c0_5, %c0_6], %5 {strides = array<i32>} : memref<8x512xf32, #tpu.memory_space<vmem>>, vector<8x512xf32>,
    %cst_7 = arith.constant dense<0.000000e+00> : vector<8xf32>
    %7 = vector.multi_reduction <add>, %5, %cst_7 [1] : vector<8x512xf32> to vector<8xf32>
    %8 = vector.shape_cast %7 : vector<8xf32> to vector<8x1xf32>
    %cst_8 = arith.constant 5.120000e+02 : f32
    %9 = vector.broadcast %cst_8 : f32 to vector<8x1xf32>
    %10 = arith.divf %8, %9 : vector<8x1xf32>
    %11 = vector.broadcast %10 : vector<8x1xf32> to vector<8x512xf32>
    %12 = arith.subf %5, %11 : vector<8x512xf32>
    %13 = vector.broadcast %10 : vector<8x1xf32> to vector<8x512xf32>
    %14 = arith.subf %5, %13 : vector<8x512xf32>
    %15 = arith.mulf %12, %14 : vector<8x512xf32>
    %cst_9 = arith.constant dense<0.000000e+00> : vector<8xf32>
    %16 = vector.multi_reduction <add>, %15, %cst_9 [1] : vector<8x512xf32> to vector<8xf32>
    %17 = vector.shape_cast %16 : vector<8xf32> to vector<8x1xf32>
    %cst_10 = arith.constant 5.120000e+02 : f32
    %18 = vector.broadcast %cst_10 : f32 to vector<8x1xf32>
    %19 = arith.divf %17, %18 : vector<8x1xf32>
    %c0_11 = arith.constant 0 : index
    %c0_12 = arith.constant 0 : index
    %20 = vector.load %arg3[%c0_11, %c0_12] : memref<8x1xf32, #tpu.memory_space<vmem>>, vector<8x1xf32>
    %cst_13 = arith.constant 9.99999974E-6 : f32
    %21 = vector.broadcast %cst_13 : f32 to vector<8x1xf32>
    %22 = arith.addf %19, %21 : vector<8x1xf32>
    %23 = math.rsqrt %22 : vector<8x1xf32>
    %24 = arith.mulf %20, %23 : vector<8x1xf32>
    %c0_14 = arith.constant 0 : index
    %c0_15 = arith.constant 0 : index
    %25 = vector.load %arg4[%c0_14, %c0_15] : memref<8x1xf32, #tpu.memory_space<vmem>>, vector<8x1xf32>
    %26 = arith.mulf %10, %24 : vector<8x1xf32>
    %27 = arith.subf %25, %26 : vector<8x1xf32>
    %28 = vector.broadcast %24 : vector<8x1xf32> to vector<8x512xf32>
    %29 = arith.mulf %5, %28 : vector<8x512xf32>
    %30 = vector.broadcast %27 : vector<8x1xf32> to vector<8x512xf32>
    %31 = arith.addf %29, %30 : vector<8x512xf32>
    %cst_16 = arith.constant 0.000000e+00 : f32
    %32 = vector.broadcast %cst_16 : f32 to vector<8x512xf32>
    %33 = arith.maximumf %31, %32 : vector<8x512xf32>
    %34 = arith.truncf %33 : vector<8x512xf32> to vector<8x512xbf16>
    %c0_17 = arith.constant 0 : index
    %c0_18 = arith.constant 0 : index
    %35 = vector.load %arg6[%c0_17, %c0_18] : memref<8x512xbf16, #tpu.memory_space<vmem>>, vector<8x512xbf16>
    tpu.vector_store %arg6[%c0_17, %c0_18], %34 {strides = array<i32>} : memref<8x512xbf16, #tpu.memory_space<vmem>>, vector<8x512xbf16>,
    return
  }
}

module attributes {stable_mosaic.version = 11 : i64} {
  func.func @_conv_bias_next_bn_relu_kernel(%arg0: memref<16x72xbf16, #tpu.memory_space<vmem>>, %arg1: memref<72x128xbf16, #tpu.memory_space<vmem>>, %arg2: memref<16x1xf32, #tpu.memory_space<vmem>>, %arg3: memref<16x1xf32, #tpu.memory_space<vmem>>, %arg4: memref<16x1xf32, #tpu.memory_space<vmem>>, %arg5: memref<16x128xf32, #tpu.memory_space<vmem>>, %arg6: memref<16x128xbf16, #tpu.memory_space<vmem>>) attributes {dimension_semantics = [], scalar_prefetch = 0 : i64, scratch_operands = 0 : i64, tpu.core_type = #tpu.core_type<tc>} {
    %c0 = arith.constant 0 : index
    %c0_0 = arith.constant 0 : index
    %0 = vector.load %arg0[%c0, %c0_0] : memref<16x72xbf16, #tpu.memory_space<vmem>>, vector<16x72xbf16>
    %c0_1 = arith.constant 0 : index
    %c0_2 = arith.constant 0 : index
    %1 = vector.load %arg1[%c0_1, %c0_2] : memref<72x128xbf16, #tpu.memory_space<vmem>>, vector<72x128xbf16>
    %cst = arith.constant dense<0.000000e+00> : vector<16x128xf32>
    %2 = tpu.matmul %0, %1, %cst {dimension_numbers = #tpu.dot_dimension_numbers<[1], [0], [0], [1], [0, 0, 1, 1], [], []>} : vector<16x72xbf16>, vector<72x128xbf16>, vector<16x128xf32> -> vector<16x128xf32>
    %c0_3 = arith.constant 0 : index
    %c0_4 = arith.constant 0 : index
    %3 = vector.load %arg2[%c0_3, %c0_4] : memref<16x1xf32, #tpu.memory_space<vmem>>, vector<16x1xf32>
    %4 = vector.broadcast %3 : vector<16x1xf32> to vector<16x128xf32>
    %5 = arith.addf %2, %4 : vector<16x128xf32>
    %c0_5 = arith.constant 0 : index
    %c0_6 = arith.constant 0 : index
    %6 = vector.load %arg5[%c0_5, %c0_6] : memref<16x128xf32, #tpu.memory_space<vmem>>, vector<16x128xf32>
    tpu.vector_store %arg5[%c0_5, %c0_6], %5 {strides = array<i32>} : memref<16x128xf32, #tpu.memory_space<vmem>>, vector<16x128xf32>,
    %cst_7 = arith.constant dense<0.000000e+00> : vector<16xf32>
    %7 = vector.multi_reduction <add>, %5, %cst_7 [1] : vector<16x128xf32> to vector<16xf32>
    %8 = vector.shape_cast %7 : vector<16xf32> to vector<16x1xf32>
    %cst_8 = arith.constant 1.280000e+02 : f32
    %9 = vector.broadcast %cst_8 : f32 to vector<16x1xf32>
    %10 = arith.divf %8, %9 : vector<16x1xf32>
    %11 = vector.broadcast %10 : vector<16x1xf32> to vector<16x128xf32>
    %12 = arith.subf %5, %11 : vector<16x128xf32>
    %13 = vector.broadcast %10 : vector<16x1xf32> to vector<16x128xf32>
    %14 = arith.subf %5, %13 : vector<16x128xf32>
    %15 = arith.mulf %12, %14 : vector<16x128xf32>
    %cst_9 = arith.constant dense<0.000000e+00> : vector<16xf32>
    %16 = vector.multi_reduction <add>, %15, %cst_9 [1] : vector<16x128xf32> to vector<16xf32>
    %17 = vector.shape_cast %16 : vector<16xf32> to vector<16x1xf32>
    %cst_10 = arith.constant 1.280000e+02 : f32
    %18 = vector.broadcast %cst_10 : f32 to vector<16x1xf32>
    %19 = arith.divf %17, %18 : vector<16x1xf32>
    %c0_11 = arith.constant 0 : index
    %c0_12 = arith.constant 0 : index
    %20 = vector.load %arg3[%c0_11, %c0_12] : memref<16x1xf32, #tpu.memory_space<vmem>>, vector<16x1xf32>
    %cst_13 = arith.constant 9.99999974E-6 : f32
    %21 = vector.broadcast %cst_13 : f32 to vector<16x1xf32>
    %22 = arith.addf %19, %21 : vector<16x1xf32>
    %23 = math.rsqrt %22 : vector<16x1xf32>
    %24 = arith.mulf %20, %23 : vector<16x1xf32>
    %c0_14 = arith.constant 0 : index
    %c0_15 = arith.constant 0 : index
    %25 = vector.load %arg4[%c0_14, %c0_15] : memref<16x1xf32, #tpu.memory_space<vmem>>, vector<16x1xf32>
    %26 = arith.mulf %10, %24 : vector<16x1xf32>
    %27 = arith.subf %25, %26 : vector<16x1xf32>
    %28 = vector.broadcast %24 : vector<16x1xf32> to vector<16x128xf32>
    %29 = arith.mulf %5, %28 : vector<16x128xf32>
    %30 = vector.broadcast %27 : vector<16x1xf32> to vector<16x128xf32>
    %31 = arith.addf %29, %30 : vector<16x128xf32>
    %cst_16 = arith.constant 0.000000e+00 : f32
    %32 = vector.broadcast %cst_16 : f32 to vector<16x128xf32>
    %33 = arith.maximumf %31, %32 : vector<16x128xf32>
    %34 = arith.truncf %33 : vector<16x128xf32> to vector<16x128xbf16>
    %c0_17 = arith.constant 0 : index
    %c0_18 = arith.constant 0 : index
    %35 = vector.load %arg6[%c0_17, %c0_18] : memref<16x128xbf16, #tpu.memory_space<vmem>>, vector<16x128xbf16>
    tpu.vector_store %arg6[%c0_17, %c0_18], %34 {strides = array<i32>} : memref<16x128xbf16, #tpu.memory_space<vmem>>, vector<16x128xbf16>,
    return
  }
}

module attributes {stable_mosaic.version = 11 : i64} {
  func.func @_conv_bias_kernel(%arg0: memref<16x144xbf16, #tpu.memory_space<vmem>>, %arg1: memref<144x128xbf16, #tpu.memory_space<vmem>>, %arg2: memref<16x1xf32, #tpu.memory_space<vmem>>, %arg3: memref<16x128xf32, #tpu.memory_space<vmem>>) attributes {dimension_semantics = [], scalar_prefetch = 0 : i64, scratch_operands = 0 : i64, tpu.core_type = #tpu.core_type<tc>} {
    %c0 = arith.constant 0 : index
    %c0_0 = arith.constant 0 : index
    %0 = vector.load %arg0[%c0, %c0_0] : memref<16x144xbf16, #tpu.memory_space<vmem>>, vector<16x144xbf16>
    %c0_1 = arith.constant 0 : index
    %c0_2 = arith.constant 0 : index
    %1 = vector.load %arg1[%c0_1, %c0_2] : memref<144x128xbf16, #tpu.memory_space<vmem>>, vector<144x128xbf16>
    %cst = arith.constant dense<0.000000e+00> : vector<16x128xf32>
    %2 = tpu.matmul %0, %1, %cst {dimension_numbers = #tpu.dot_dimension_numbers<[1], [0], [0], [1], [0, 0, 1, 1], [], []>} : vector<16x144xbf16>, vector<144x128xbf16>, vector<16x128xf32> -> vector<16x128xf32>
    %c0_3 = arith.constant 0 : index
    %c0_4 = arith.constant 0 : index
    %3 = vector.load %arg2[%c0_3, %c0_4] : memref<16x1xf32, #tpu.memory_space<vmem>>, vector<16x1xf32>
    %4 = vector.broadcast %3 : vector<16x1xf32> to vector<16x128xf32>
    %5 = arith.addf %2, %4 : vector<16x128xf32>
    %c0_5 = arith.constant 0 : index
    %c0_6 = arith.constant 0 : index
    %6 = vector.load %arg3[%c0_5, %c0_6] : memref<16x128xf32, #tpu.memory_space<vmem>>, vector<16x128xf32>
    tpu.vector_store %arg3[%c0_5, %c0_6], %5 {strides = array<i32>} : memref<16x128xf32, #tpu.memory_space<vmem>>, vector<16x128xf32>,
    return
  }
}

</mosaic_0001>

<bundles_post_ra>
// kernel: _lambda_.5
= control target key start
LH: loop header
LB: loop body
LE: loop exit
PB: predicated region body
PF: predicated region fallthrough
CT: control target
= control target key end

     0   :  { %vm210_vm0 = vcmask 1044480   ;;  %vm211_vm1 = vcmask 1045504   ;;  %v991_v2 = vmov 65535   ;;  %v992_v5 = vmov 0   ;;  %s1449_s1 = inlined_call_operand.vmem [shape: bf16[27,2048], index: 1, kind: input, shape index: {}]   ;;  %s1450_s0 = inlined_call_operand.vmem [shape: bf16[3,27], index: 0, kind: input, shape index: {}]   ;;  %s1451_s2 = inlined_call_operand.vmem [shape: f32[3,1], index: 2, kind: input, shape index: {}]   ;;  %s1452_s5 = inlined_call_operand.vmem [shape: f32[3,2048], index: 5, kind: output, shape index: {0}]   ;;  %s1453_s3 = inlined_call_operand.vmem [shape: f32[3,1], index: 3, kind: input, shape index: {}]   ;;  %s1454_s4 = inlined_call_operand.vmem [shape: f32[3,1], index: 4, kind: input, shape index: {}]   ;;  %s1455_s6 = inlined_call_operand.vmem [shape: bf16[3,2048], index: 6, kind: output, shape index: {1}]  }
   0x1   :  { %v40_v0 = vld [vmem:[%s1449_s1 + $0x80] sm:$0xff]  ;;  %v212_v3 = vsel %vm210_vm0, 4294967295, %v991_v2  ;;  %v41_v4 = vld [vmem:[%s1449_s1 + $0x88] sm:$0xff]  ;;  %294 = vmatprep.mubr.bf16.mxu0 %v992_v5  ;;  %335 = vmatprep.mubr.bf16.mxu1 %v992_v5  ;;  %v42_v19 = vld [vmem:[%s1449_s1 + $0x90] sm:$0xff]  ;;  %vm206_vm2 = vcmask 220160   ;;  %vm630_vm3 = vcmask 1042432  }
   0x2   :  { %v48_v1 = vld [vmem:[%s1449_s1 + $0xc0] sm:$0x33]  ;;  %v1040_v7 = vsel %vm211_vm1, %v212_v3, 0  ;;  %v49_v8 = vld [vmem:[%s1449_s1 + $0xc8] sm:$0x33]  ;;  %987 = vset.pattern.permute.xlu0 %v992_v5  ;;  %988 = vset.pattern.permute.xlu1 %v992_v5  ;;  %v43_v21 = vld [vmem:[%s1449_s1 + $0x98] sm:$0xff] }
   0x3   :  { %v953_v6 = vcombine.high %v40_v0, %v48_v1  ;;  %v952_v9 = vcombine.low %v40_v0, %v48_v1  ;;  %v24_v10 = vld [vmem:[%s1449_s1] sm:$0xff]  ;;  %v955_v12 = vcombine.high %v41_v4, %v49_v8  ;;  %v954_v13 = vcombine.low %v41_v4, %v49_v8  ;;  %v25_v14 = vld [vmem:[%s1449_s1 + $0x8] sm:$0xff]  ;;  %v50_v20 = vld [vmem:[%s1449_s1 + $0xd0] sm:$0x33] }
   0x4   :  { %v32_v11 = vld [vmem:[%s1449_s1 + $0x40] sm:$0xff]  ;;  %v33_v15 = vld [vmem:[%s1449_s1 + $0x48] sm:$0xff]  ;;  %v957_v25 = vcombine.high %v42_v19, %v50_v20  ;;  %v51_v26 = vld [vmem:[%s1449_s1 + $0xd8] sm:$0x33]  ;;  %v956_v29 = vcombine.low %v42_v19, %v50_v20  ;;  %vm901_vm4 = vcmask 1041408   ;;  %vm904_vm6 = vcmask 1043458  }
   0x5   :  { %v218_v16 = vand.u32 %v953_v6, %v1040_v7  ;;  %v215_v17 = vand.u32 %v952_v9, %v1040_v7  ;;  %v937_v18 = vcombine.high %v24_v10, %v32_v11  ;;  %v224_v22 = vand.u32 %v955_v12, %v1040_v7  ;;  %v26_v33 = vld [vmem:[%s1449_s1 + $0x10] sm:$0xff]  ;;  %v27_v36 = vld [vmem:[%s1449_s1 + $0x18] sm:$0xff]  ;;  %v44_v37 = vld [vmem:[%s1449_s1 + $0xa0] sm:$0xff] }
   0x6   :  { %v221_v23 = vand.u32 %v954_v13, %v1040_v7  ;;  %v939_v24 = vcombine.high %v25_v14, %v33_v15  ;;  %v959_v27 = vcombine.high %v43_v21, %v51_v26  ;;  %v936_v28 = vcombine.low %v24_v10, %v32_v11  ;;  %v34_v34 = vld [vmem:[%s1449_s1 + $0x50] sm:$0xff]  ;;  %v52_v38 = vld [vmem:[%s1449_s1 + $0xe0] sm:$0x33]  ;;  %v35_v39 = vld [vmem:[%s1449_s1 + $0x58] sm:$0xff] }
   0x7   :  { %274 = vmatprep.subr.bf16.mxu0 %v218_v16  ;;  %315 = vmatprep.subr.bf16.mxu1 %v224_v22  ;;  %v938_v30 = vcombine.low %v25_v14, %v33_v15  ;;  %v230_v31 = vand.u32 %v957_v25, %v1040_v7  ;;  %v958_v32 = vcombine.low %v43_v21, %v51_v26  ;;  %v45_v40 = vld [vmem:[%s1449_s1 + $0xa8] sm:$0xff]  ;;  %v1104_v42 = vld [vmem:[%s1450_s0] sm:$0x3]  ;;  %v46_v59 = vld [vmem:[%s1449_s1 + $0xb0] sm:$0xff]  ;;  %vm902_vm5 = vsmask.f32 1280 }
   0x8   :  { %275 = vmatpush1.bf16.msra.mxu0 %v215_v17  ;;  %316 = vmatpush1.bf16.msra.mxu1 %v221_v23  ;;  %v236_v35 = vand.u32 %v959_v27, %v1040_v7  ;;  %v53_v41 = vld [vmem:[%s1449_s1 + $0xe8] sm:$0x33]  ;;  %v227_v43 = vand.u32 %v956_v29, %v1040_v7  ;;  %v941_v45 = vcombine.high %v26_v33, %v34_v34  ;;  %v56_v51 = vld [vmem:[%s1451_s2] sm:$0x7]  ;;  %v54_v60 = vld [vmem:[%s1449_s1 + $0xf0] sm:$0x33] }
   0x9   :  { %276 = vmatprep.subr.bf16.mxu0 %v937_v18  ;;  %317 = vmatprep.subr.bf16.mxu1 %v939_v24  ;;  %v233_v44 = vand.u32 %v958_v32, %v1040_v7  ;;  %v961_v46 = vcombine.high %v44_v37, %v52_v38  ;;  %v943_v47 = vcombine.high %v27_v36, %v35_v39  ;;  %v28_v55 = vld [vmem:[%s1449_s1 + $0x20] sm:$0xff]  ;;  %v29_v58 = vld [vmem:[%s1449_s1 + $0x28] sm:$0xff]  ;;  %v47_v62 = vld [vmem:[%s1449_s1 + $0xb8] sm:$0xff]  ;;  %vm905_vm7 = vsmask.f32 3328 }
   0xa   :  { %v963_v48 = vcombine.high %v45_v40, %v53_v41  ;;  %v940_v49 = vcombine.low %v26_v33, %v34_v34  ;;  %v960_v50 = vcombine.low %v44_v37, %v52_v38  ;;  %v942_v52 = vcombine.low %v27_v36, %v35_v39  ;;  %v36_v56 = vld [vmem:[%s1449_s1 + $0x60] sm:$0xff]  ;;  %v37_v61 = vld [vmem:[%s1449_s1 + $0x68] sm:$0xff]  ;;  %v55_v63 = vld [vmem:[%s1449_s1 + $0xf8] sm:$0x33]  ;;  %59 = vperm.xlu0 %987, %v56_v51  }
   0xb   :  { %v242_v53 = vand.u32 %v961_v46, %v1040_v7  ;;  %v962_v54 = vcombine.low %v45_v40, %v53_v41  ;;  %v945_v2 = vcombine.high %v28_v55, %v36_v56  ;;  %v965_v3 = vcombine.high %v46_v59, %v54_v60  ;;  %v30_v14 = vld [vmem:[%s1449_s1 + $0x30] sm:$0xff]  ;;  %v31_v16 = vld [vmem:[%s1449_s1 + $0x38] sm:$0xff]  ;;  %vm1376_vm12 = vmand %vm901_vm4, %vm902_vm5 }
   0xc   :  { %277 = vmatpush1.bf16.msra.mxu0 %v936_v28  ;;  %318 = vmatpush1.bf16.msra.mxu1 %v938_v30  ;;  %v248_v57 = vand.u32 %v963_v48, %v1040_v7  ;;  %v239_v0 = vand.u32 %v960_v50, %v1040_v7  ;;  %v947_v4 = vcombine.high %v29_v58, %v37_v61  ;;  %v38_v15 = vld [vmem:[%s1449_s1 + $0x70] sm:$0xff]  ;;  %v39_v17 = vld [vmem:[%s1449_s1 + $0x78] sm:$0xff]  ;;  %vm908_vm8 = vcmask 1045508   ;;  %vm1382_vm13 = vmand %vm904_vm6, %vm905_vm7 }
   0xd   :  { %356 = vmatprep.subr.bf16.mxu0 %v230_v31  ;;  %397 = vmatprep.subr.bf16.mxu1 %v236_v35  ;;  %v245_v1 = vand.u32 %v962_v54, %v1040_v7  ;;  %v967_v6 = vcombine.high %v47_v62, %v55_v63  ;;  %v944_v8 = vcombine.low %v28_v55, %v36_v56  ;;  %vm909_vm9 = vsmask.f32 5376  ;;  %vm907_vm14 = vmor %vm1382_vm13, %vm1376_vm12 }
   0xe   :  { %v964_v9 = vcombine.low %v46_v59, %v54_v60  ;;  %v946_v10 = vcombine.low %v29_v58, %v37_v61  ;;  %v254_v11 = vand.u32 %v965_v3, %v1040_v7  ;;  %v966_v12 = vcombine.low %v47_v62, %v55_v63  ;;  %vm910_vm15 = vmand %vm908_vm8, %vm909_vm9 }
   0xf   :  { %968 = vmatmul.mubr.msk.bf16.vlgmr.msra.gmra.mxu0 %vm206_vm2, %v1104_v42  ;;  %969 = vmatmul.mubr.msk.bf16.vlgmr.msra.gmra.mxu1 %vm206_vm2, %v1104_v42  ;;  %v260_v13 = vand.u32 %v967_v6, %v1040_v7  ;;  %v949_v20 = vcombine.high %v30_v14, %v38_v15  ;;  %v951_v21 = vcombine.high %v31_v16, %v39_v17  ;;  %vm912_vm10 = vcmask 1047558   ;;  %vm1397_vm0 = vmor %vm910_vm15, %vm907_vm14 }
  0x10   :  { %357 = vmatpush1.bf16.msra.mxu0 %v227_v43  ;;  %398 = vmatpush1.bf16.msra.mxu1 %v233_v44  ;;  %v251_v18 = vand.u32 %v964_v9, %v1040_v7  ;;  %v257_v19 = vand.u32 %v966_v12, %v1040_v7  ;;  %v948_v22 = vcombine.low %v30_v14, %v38_v15  ;;  %vm913_vm11 = vsmask.f32 7424 }
  0x11   :  { %358 = vmatprep.subr.bf16.mxu0 %v941_v45  ;;  %399 = vmatprep.subr.bf16.mxu1 %v943_v47  ;;  %v950_v23 = vcombine.low %v31_v16, %v39_v17  ;;  %vm914_vm1 = vmand %vm912_vm10, %vm913_vm11 }
  0x12   :  { %376 = vmatprep.mubr.bf16.mxu0 %v992_v5  ;;  %417 = vmatprep.mubr.bf16.mxu1 %v992_v5 }
  0x14   :  { %359 = vmatpush1.bf16.msra.mxu0 %v940_v49  ;;  %400 = vmatpush1.bf16.msra.mxu1 %v942_v52 }
  0x15   :  { %438 = vmatprep.subr.bf16.mxu0 %v242_v53  ;;  %479 = vmatprep.subr.bf16.mxu1 %v248_v57 }
  0x17   :  { %970 = vmatmul.mubr.msk.bf16.vlgmr.msra.gmra.mxu0 %vm206_vm2, %v1104_v42  ;;  %971 = vmatmul.mubr.msk.bf16.vlgmr.msra.gmra.mxu1 %vm206_vm2, %v1104_v42 }
  0x18   :  { %439 = vmatpush1.bf16.msra.mxu0 %v239_v0  ;;  %480 = vmatpush1.bf16.msra.mxu1 %v245_v1 }
  0x19   :  { %440 = vmatprep.subr.bf16.mxu0 %v945_v2  ;;  %481 = vmatprep.subr.bf16.mxu1 %v947_v4 }
  0x1a   :  { %458 = vmatprep.mubr.bf16.mxu0 %v992_v5  ;;  %499 = vmatprep.mubr.bf16.mxu1 %v992_v5 }
  0x1c   :  { %441 = vmatpush1.bf16.msra.mxu0 %v944_v8  ;;  %482 = vmatpush1.bf16.msra.mxu1 %v946_v10 }
  0x1d   :  { %520 = vmatprep.subr.bf16.mxu0 %v254_v11  ;;  %561 = vmatprep.subr.bf16.mxu1 %v260_v13 }
  0x1f   :  { %972 = vmatmul.mubr.msk.bf16.vlgmr.msra.gmra.mxu0 %vm206_vm2, %v1104_v42  ;;  %973 = vmatmul.mubr.msk.bf16.vlgmr.msra.gmra.mxu1 %vm206_vm2, %v1104_v42 }
  0x20   :  { %521 = vmatpush1.bf16.msra.mxu0 %v251_v18  ;;  %562 = vmatpush1.bf16.msra.mxu1 %v257_v19 }
  0x21   :  { %522 = vmatprep.subr.bf16.mxu0 %v949_v20  ;;  %563 = vmatprep.subr.bf16.mxu1 %v951_v21 }
  0x22   :  { %540 = vmatprep.mubr.bf16.mxu0 %v992_v5  ;;  %581 = vmatprep.mubr.bf16.mxu1 %v992_v5 }
  0x24   :  { %523 = vmatpush1.bf16.msra.mxu0 %v948_v22  ;;  %564 = vmatpush1.bf16.msra.mxu1 %v950_v23 }
  0x27   :  { %974 = vmatmul.mubr.msk.bf16.vlgmr.msra.gmra.mxu0 %vm206_vm2, %v1104_v42  ;;  %975 = vmatmul.mubr.msk.bf16.vlgmr.msra.gmra.mxu1 %vm206_vm2, %v1104_v42  ;;  %vm1409_vm2 = vmor %vm914_vm1, %vm1397_vm0 }
  0x85   :  { %v1177_v7 = vpop.permute.xlu0 %59 }
  0xcf   :  { %v296_v24 = vpop.f32.mrf.mxu0  ;;  %v337_v25 = vpop.f32.mrf.mxu1 }
  0xd0   :  { %v1180_v26 = vadd.f32 %v296_v24, %v1177_v7  ;;  %v1183_v28 = vadd.f32 %v337_v25, %v1177_v7 }
  0xd1   :  { %v298_v27 = vpop.f32.mrf.mxu0  ;;  %v339_v29 = vpop.f32.mrf.mxu1 }
  0xd2   :  { %v1186_v5 = vadd.f32 %v298_v27, %v1177_v7  ;;  %v1189_v30 = vadd.f32 %v339_v29, %v1177_v7  ;;  %v631_v33 = vsel %vm630_vm3, %v1180_v26, 0.0  ;;  %v634_v39 = vsel %vm630_vm3, %v1183_v28, 0.0 }
  0xd3   :  { %v300_v31 = vpop.f32.mrf.mxu0  ;;  %v341_v35 = vpop.f32.mrf.mxu1 }
  0xd4   :  { %v606_v32 = vcombine.low %v1180_v26, %v1186_v5  ;;  %v632_v34 = vsel %vm630_vm3, %v1186_v5, 0.0  ;;  %v607_v37 = vcombine.low %v1183_v28, %v1189_v30  ;;  %v636_v43 = vsel %vm630_vm3, %v1189_v30, 0.0 }
  0xd5   :  { %v633_v36 = vadd.f32 %v632_v34, %v631_v33  ;;  %v301_v38 = vpop.f32.mrf.mxu0  ;;  %v342_v40 = vpop.f32.mrf.mxu1 }
  0xd6   :  { %622 = vst [vmem:[%s1452_s5] sm:$0x77] %v606_v32  ;;  %623 = vst [vmem:[%s1452_s5 + $0x8] sm:$0x77] %v607_v37 }
  0xd7   :  { %v635_v41 = vadd.f32 %v634_v39, %v633_v36  ;;  %v378_v42 = vpop.f32.mrf.mxu0  ;;  %v419_v45 = vpop.f32.mrf.mxu1 }
  0xd8   :  { %v1210_v44 = vadd.f32 %v378_v42, %v1177_v7  ;;  %v1215_v49 = vadd.f32 %v419_v45, %v1177_v7 }
  0xd9   :  { %v637_v46 = vadd.f32 %v636_v43, %v635_v41  ;;  %v380_v47 = vpop.f32.mrf.mxu0  ;;  %v421_v51 = vpop.f32.mrf.mxu1 }
  0xda   :  { %v638_v48 = vsel %vm630_vm3, %v1210_v44, 0.0  ;;  %v1218_v50 = vadd.f32 %v380_v47, %v1177_v7  ;;  %v1221_v53 = vadd.f32 %v421_v51, %v1177_v7  ;;  %v642_v61 = vsel %vm630_vm3, %v1215_v49, 0.0 }
  0xdb   :  { %v639_v52 = vadd.f32 %v638_v48, %v637_v46  ;;  %v382_v54 = vpop.f32.mrf.mxu0  ;;  %v423_v57 = vpop.f32.mrf.mxu1 }
  0xdc   :  { %v608_v55 = vcombine.low %v1210_v44, %v1218_v50  ;;  %v640_v56 = vsel %vm630_vm3, %v1218_v50, 0.0  ;;  %v609_v59 = vcombine.low %v1215_v49, %v1221_v53  ;;  %v644_v1 = vsel %vm630_vm3, %v1221_v53, 0.0 }
  0xdd   :  { %v641_v58 = vadd.f32 %v640_v56, %v639_v52  ;;  %v383_v60 = vpop.f32.mrf.mxu0  ;;  %v424_v62 = vpop.f32.mrf.mxu1 }
  0xde   :  { %624 = vst [vmem:[%s1452_s5 + $0x10] sm:$0x77] %v608_v55  ;;  %625 = vst [vmem:[%s1452_s5 + $0x18] sm:$0x77] %v609_v59 }
  0xdf   :  { %v643_v63 = vadd.f32 %v642_v61, %v641_v58  ;;  %v460_v0 = vpop.f32.mrf.mxu0  ;;  %v501_v3 = vpop.f32.mrf.mxu1 }
  0xe0   :  { %v1240_v2 = vadd.f32 %v460_v0, %v1177_v7  ;;  %v1245_v9 = vadd.f32 %v501_v3, %v1177_v7 }
  0xe1   :  { %v645_v4 = vadd.f32 %v644_v1, %v643_v63  ;;  %v462_v6 = vpop.f32.mrf.mxu0  ;;  %v503_v11 = vpop.f32.mrf.mxu1 }
  0xe2   :  { %v646_v8 = vsel %vm630_vm3, %v1240_v2, 0.0  ;;  %v1248_v10 = vadd.f32 %v462_v6, %v1177_v7  ;;  %v1251_v13 = vadd.f32 %v503_v11, %v1177_v7  ;;  %v650_v21 = vsel %vm630_vm3, %v1245_v9, 0.0 }
  0xe3   :  { %v647_v12 = vadd.f32 %v646_v8, %v645_v4  ;;  %v464_v14 = vpop.f32.mrf.mxu0  ;;  %v505_v17 = vpop.f32.mrf.mxu1 }
  0xe4   :  { %v610_v15 = vcombine.low %v1240_v2, %v1248_v10  ;;  %v648_v16 = vsel %vm630_vm3, %v1248_v10, 0.0  ;;  %v611_v19 = vcombine.low %v1245_v9, %v1251_v13  ;;  %v652_v25 = vsel %vm630_vm3, %v1251_v13, 0.0 }
  0xe5   :  { %v649_v18 = vadd.f32 %v648_v16, %v647_v12  ;;  %v465_v20 = vpop.f32.mrf.mxu0  ;;  %v506_v22 = vpop.f32.mrf.mxu1 }
  0xe6   :  { %626 = vst [vmem:[%s1452_s5 + $0x20] sm:$0x77] %v610_v15  ;;  %627 = vst [vmem:[%s1452_s5 + $0x28] sm:$0x77] %v611_v19 }
  0xe7   :  { %v542_v23 = vpop.f32.mrf.mxu0  ;;  %v651_v24 = vadd.f32 %v650_v21, %v649_v18  ;;  %v583_v29 = vpop.f32.mrf.mxu1 }
  0xe8   :  { %v1270_v27 = vadd.f32 %v542_v23, %v1177_v7  ;;  %v1273_v33 = vadd.f32 %v583_v29, %v1177_v7 }
  0xe9   :  { %v544_v31 = vpop.f32.mrf.mxu0  ;;  %v653_v32 = vadd.f32 %v652_v25, %v651_v24  ;;  %v585_v35 = vpop.f32.mrf.mxu1 }
  0xea   :  { %v1276_v34 = vadd.f32 %v544_v31, %v1177_v7  ;;  %v654_v36 = vsel %vm630_vm3, %v1270_v27, 0.0  ;;  %v1281_v37 = vadd.f32 %v585_v35, %v1177_v7  ;;  %v658_v47 = vsel %vm630_vm3, %v1273_v33, 0.0 }
  0xeb   :  { %v546_v38 = vpop.f32.mrf.mxu0  ;;  %v655_v39 = vadd.f32 %v654_v36, %v653_v32  ;;  %v587_v41 = vpop.f32.mrf.mxu1 }
  0xec   :  { %v612_v40 = vcombine.low %v1270_v27, %v1276_v34  ;;  %v656_v42 = vsel %vm630_vm3, %v1276_v34, 0.0  ;;  %v613_v43 = vcombine.low %v1273_v33, %v1281_v37  ;;  %v660_v51 = vsel %vm630_vm3, %v1281_v37, 0.0 }
  0xed   :  { %v547_v45 = vpop.f32.mrf.mxu0  ;;  %v657_v46 = vadd.f32 %v656_v42, %v655_v39  ;;  %v588_v7 = vpop.f32.mrf.mxu1 }
  0xee   :  { %628 = vst [vmem:[%s1452_s5 + $0x30] sm:$0x77] %v612_v40  ;;  %629 = vst [vmem:[%s1452_s5 + $0x38] sm:$0x77] %v613_v43 }
  0xef   :  { %v659_v48 = vadd.f32 %v658_v47, %v657_v46 }
  0xf1   :  { %v661_v52 = vadd.f32 %v660_v51, %v659_v48 }
  0xf3   :  { %662 = vadd.xlane.f32.xlu0 %v661_v52 }
 0x17c   :  { %v663_v54 = vpop.xlane.xlu0 %662 }
 0x17d   :  { %v1299_v55 = vmul.f32 0.00048828125, %v663_v54 }
 0x17f   :  { %v666_v56 = vsub.f32 %v1180_v26, %v1299_v55  ;;  %v667_v57 = vsub.f32 %v1186_v5, %v1299_v55  ;;  %v668_v58 = vsub.f32 %v1183_v28, %v1299_v55  ;;  %v669_v59 = vsub.f32 %v1189_v30, %v1299_v55 }
 0x180   :  { %v670_v62 = vsub.f32 %v1210_v44, %v1299_v55  ;;  %v671_v0 = vsub.f32 %v1218_v50, %v1299_v55  ;;  %v672_v8 = vsub.f32 %v1215_v49, %v1299_v55  ;;  %v673_v15 = vsub.f32 %v1221_v53, %v1299_v55 }
 0x181   :  { %v682_v60 = vmul.f32 %v666_v56, %v666_v56  ;;  %v683_v61 = vmul.f32 %v667_v57, %v667_v57  ;;  %v684_v63 = vmul.f32 %v668_v58, %v668_v58  ;;  %v685_v1 = vmul.f32 %v669_v59, %v669_v59 }
 0x182   :  { %v686_v11 = vmul.f32 %v670_v62, %v670_v62  ;;  %v687_v16 = vmul.f32 %v671_v0, %v671_v0  ;;  %v674_v19 = vsub.f32 %v1240_v2, %v1299_v55  ;;  %v688_v20 = vmul.f32 %v672_v8, %v672_v8 }
 0x183   :  { %v698_v3 = vsel %vm630_vm3, %v682_v60, 0.0  ;;  %v699_v4 = vsel %vm630_vm3, %v683_v61, 0.0  ;;  %v701_v12 = vsel %vm630_vm3, %v684_v63, 0.0  ;;  %v703_v17 = vsel %vm630_vm3, %v685_v1, 0.0 }
 0x184   :  { %v700_v6 = vadd.f32 %v699_v4, %v698_v3  ;;  %v705_v21 = vsel %vm630_vm3, %v686_v11, 0.0  ;;  %v675_v23 = vsub.f32 %v1248_v10, %v1299_v55  ;;  %v689_v24 = vmul.f32 %v673_v15, %v673_v15 }
 0x185   :  { %v707_v25 = vsel %vm630_vm3, %v687_v16, 0.0  ;;  %v676_v31 = vsub.f32 %v1245_v9, %v1299_v55  ;;  %v690_v32 = vmul.f32 %v674_v19, %v674_v19  ;;  %v709_v35 = vsel %vm630_vm3, %v688_v20, 0.0  ;;  %v736_v20 = vld [vmem:[%s1454_s4] sm:$0x7] }
 0x186   :  { %v702_v14 = vadd.f32 %v701_v12, %v700_v6  ;;  %v677_v38 = vsub.f32 %v1251_v13, %v1299_v55  ;;  %v691_v39 = vmul.f32 %v675_v23, %v675_v23  ;;  %v711_v40 = vsel %vm630_vm3, %v689_v24, 0.0 }
 0x187   :  { %v678_v42 = vsub.f32 %v1270_v27, %v1299_v55  ;;  %v692_v43 = vmul.f32 %v676_v31, %v676_v31  ;;  %v713_v45 = vsel %vm630_vm3, %v690_v32, 0.0  ;;  %v679_v7 = vsub.f32 %v1276_v34, %v1299_v55 }
 0x188   :  { %v704_v18 = vadd.f32 %v703_v17, %v702_v14  ;;  %v693_v47 = vmul.f32 %v677_v38, %v677_v38  ;;  %v715_v48 = vsel %vm630_vm3, %v691_v39, 0.0  ;;  %v680_v52 = vsub.f32 %v1273_v33, %v1299_v55  ;;  %v732_v17 = vld [vmem:[%s1453_s3] sm:$0x7] }
 0x189   :  { %v694_v54 = vmul.f32 %v678_v42, %v678_v42  ;;  %v717_v56 = vsel %vm630_vm3, %v692_v43, 0.0  ;;  %v681_v58 = vsub.f32 %v1281_v37, %v1299_v55  ;;  %v695_v59 = vmul.f32 %v679_v7, %v679_v7 }
 0x18a   :  { %v706_v22 = vadd.f32 %v705_v21, %v704_v18  ;;  %v719_v60 = vsel %vm630_vm3, %v693_v47, 0.0  ;;  %v696_v62 = vmul.f32 %v680_v52, %v680_v52  ;;  %v993_v23 = vmov 1983009808  }
 0x18b   :  { %v721_v63 = vsel %vm630_vm3, %v694_v54, 0.0  ;;  %v697_v1 = vmul.f32 %v681_v58, %v681_v58  ;;  %v723_v3 = vsel %vm630_vm3, %v695_v59, 0.0  ;;  %v832_v24 = vunpack.c.l.s4 %v993_v23 }
 0x18c   :  { %v708_v29 = vadd.f32 %v707_v25, %v706_v22  ;;  %v725_v6 = vsel %vm630_vm3, %v696_v62, 0.0  ;;  %v834_v25 = vlaneseq }
 0x18d   :  { %v727_v11 = vsel %vm630_vm3, %v697_v1, 0.0 }
 0x18e   :  { %v710_v36 = vadd.f32 %v709_v35, %v708_v29  ;;  %v833_v29 = vunpack.c.0.s8 %v832_v24  ;;  %v835_v31 = vshrl.u32 %v834_v25, 7 }
 0x190   :  { %v712_v41 = vadd.f32 %v711_v40, %v710_v36  ;;  %v1356_v35 = vsub.s32 %v833_v29, %v835_v31 }
 0x192   :  { %v714_v46 = vadd.f32 %v713_v45, %v712_v41 }
 0x194   :  { %v716_v51 = vadd.f32 %v715_v48, %v714_v46 }
 0x196   :  { %v718_v57 = vadd.f32 %v717_v56, %v716_v51 }
 0x198   :  { %v720_v61 = vadd.f32 %v719_v60, %v718_v57 }
 0x19a   :  { %v722_v0 = vadd.f32 %v721_v63, %v720_v61 }
 0x19c   :  { %v724_v4 = vadd.f32 %v723_v3, %v722_v0 }
 0x19e   :  { %v726_v8 = vadd.f32 %v725_v6, %v724_v4 }
 0x1a0   :  { %v728_v12 = vadd.f32 %v727_v11, %v726_v8 }
 0x1a2   :  { %729 = vadd.xlane.f32.xlu1 %v728_v12 }
 0x22b   :  { %v730_v14 = vpop.xlane.xlu1 %729 }
 0x22c   :  { %v731_v15 = vmul.f32 0.00048828125, %v730_v14 }
 0x22e   :  { %v733_v16 = vadd.f32 1e-05, %v731_v15 }
 0x230   :  { %989 = vrsqrt.f32 %v733_v16 }
 0x23d   :  { %v990_v18 = vpop.eup %989 }
 0x23e   :  { %v735_v19 = vmul.f32 %v990_v18, %v732_v17 }
 0x240   :  { %741 = vperm.xlu1 %988, %v735_v19   ;;  %v737_v21 = vmul.f32 %v735_v19, %v1299_v55 }
 0x242   :  { %v738_v22 = vsub.f32 %v736_v20, %v737_v21 }
 0x244   :  { %762 = vperm.xlu1 %988, %v738_v22  }
 0x2bb   :  { %v742_v32 = vpop.permute.xlu1 %741 }
 0x2bc   :  { %v744_v36 = vmul.f32 %v742_v32, %v1180_v26  ;;  %v745_v55 = vmul.f32 %v742_v32, %v1186_v5  ;;  %v746_v38 = vmul.f32 %v742_v32, %v1183_v28  ;;  %v747_v39 = vmul.f32 %v742_v32, %v1189_v30 }
 0x2bd   :  { %v748_v40 = vmul.f32 %v742_v32, %v1210_v44  ;;  %v749_v41 = vmul.f32 %v742_v32, %v1218_v50  ;;  %v750_v42 = vmul.f32 %v742_v32, %v1215_v49  ;;  %v751_v43 = vmul.f32 %v742_v32, %v1221_v53 }
 0x2be   :  { %v752_v45 = vmul.f32 %v742_v32, %v1240_v2  ;;  %v753_v26 = vmul.f32 %v742_v32, %v1248_v10  ;;  %v754_v5 = vmul.f32 %v742_v32, %v1245_v9  ;;  %v755_v28 = vmul.f32 %v742_v32, %v1251_v13 }
 0x2bf   :  { %v756_v30 = vmul.f32 %v742_v32, %v1270_v27  ;;  %v757_v44 = vmul.f32 %v742_v32, %v1276_v34  ;;  %v758_v50 = vmul.f32 %v742_v32, %v1273_v33  ;;  %v759_v49 = vmul.f32 %v742_v32, %v1281_v37  ;;  %v763_v2 = vpop.permute.xlu1 %762 }
 0x2c0   :  { %v765_v10 = vadd.f32 %v763_v2, %v744_v36  ;;  %v766_v13 = vadd.f32 %v763_v2, %v745_v55  ;;  %v767_v27 = vadd.f32 %v763_v2, %v746_v38  ;;  %v768_v34 = vadd.f32 %v763_v2, %v747_v39  ;;  %v916_v38 = vld [vmem:[%s1455_s6] sm:$0xff]  ;;  %v919_v39 = vld [vmem:[%s1455_s6 + $0x8] sm:$0xff] }
 0x2c1   :  { %v769_v33 = vadd.f32 %v763_v2, %v748_v40  ;;  %v770_v46 = vadd.f32 %v763_v2, %v749_v41  ;;  %v771_v37 = vadd.f32 %v763_v2, %v750_v42  ;;  %v772_v7 = vadd.f32 %v763_v2, %v751_v43 }
 0x2c2   :  { %v773_v47 = vadd.f32 %v763_v2, %v752_v45  ;;  %v774_v48 = vadd.f32 %v763_v2, %v753_v26  ;;  %v775_v51 = vadd.f32 %v763_v2, %v754_v5  ;;  %v776_v52 = vadd.f32 %v763_v2, %v755_v28  ;;  %v922_v45 = vld [vmem:[%s1455_s6 + $0x10] sm:$0xff]  ;;  %v925_v26 = vld [vmem:[%s1455_s6 + $0x18] sm:$0xff] }
 0x2c3   :  { %v777_v54 = vadd.f32 %v763_v2, %v756_v30  ;;  %v778_v56 = vadd.f32 %v763_v2, %v757_v44  ;;  %v779_v57 = vadd.f32 %v763_v2, %v758_v50  ;;  %v780_v58 = vadd.f32 %v763_v2, %v759_v49 }
 0x2c4   :  { %v781_v59 = vmax.f32 %v765_v10, 0.0  ;;  %v782_v60 = vmax.f32 %v766_v13, 0.0  ;;  %v783_v61 = vmax.f32 %v767_v27, 0.0  ;;  %v784_v62 = vmax.f32 %v768_v34, 0.0 }
 0x2c5   :  { %v785_v63 = vmax.f32 %v769_v33, 0.0  ;;  %v786_v0 = vmax.f32 %v770_v46, 0.0  ;;  %v787_v1 = vmax.f32 %v771_v37, 0.0  ;;  %v788_v3 = vmax.f32 %v772_v7, 0.0 }
 0x2c6   :  { %v789_v4 = vmax.f32 %v773_v47, 0.0  ;;  %v790_v6 = vmax.f32 %v774_v48, 0.0  ;;  %v791_v8 = vmax.f32 %v775_v51, 0.0  ;;  %v792_v11 = vmax.f32 %v776_v52, 0.0 }
 0x2c7   :  { %v793_v14 = vmax.f32 %v777_v54, 0.0  ;;  %v794_v15 = vmax.f32 %v778_v56, 0.0  ;;  %v795_v16 = vmax.f32 %v779_v57, 0.0  ;;  %v796_v17 = vmax.f32 %v780_v58, 0.0 }
 0x2c8   :  { %v976_v18 = vpack.c.bf16 %v782_v60, %v781_v59  ;;  %v977_v19 = vpack.c.bf16 %v784_v62, %v783_v61  ;;  %v978_v20 = vpack.c.bf16 %v786_v0, %v785_v63  ;;  %v979_v21 = vpack.c.bf16 %v788_v3, %v787_v1 }
 0x2c9   :  { %v980_v22 = vpack.c.bf16 %v790_v6, %v789_v4  ;;  %v981_v23 = vpack.c.bf16 %v792_v11, %v791_v8  ;;  %v982_v24 = vpack.c.bf16 %v794_v15, %v793_v14  ;;  %v983_v25 = vpack.c.bf16 %v796_v17, %v795_v16 }
 0x2ca   :  { %v837_v29 = vrot.slane %v976_v18, %v1356_v35  ;;  %v844_v31 = vrot.slane %v977_v19, %v1356_v35  ;;  %v854_v32 = vrot.slane %v978_v20, %v1356_v35  ;;  %v861_v36 = vrot.slane %v979_v21, %v1356_v35 }
 0x2cb   :  { %v871_v40 = vrot.slane %v980_v22, %v1356_v35  ;;  %v878_v41 = vrot.slane %v981_v23, %v1356_v35  ;;  %v888_v42 = vrot.slane %v982_v24, %v1356_v35  ;;  %v895_v43 = vrot.slane %v983_v25, %v1356_v35 }
 0x2cc   :  { %v845_v5 = vcombine.low %v837_v29, %v844_v31  ;;  %v862_v28 = vcombine.low %v854_v32, %v861_v36 }
 0x2cd   :  { %v879_v30 = vcombine.low %v871_v40, %v878_v41  ;;  %v896_v44 = vcombine.low %v888_v42, %v895_v43 }
 0x2ce   :  { %v917_v50 = vsel %vm1409_vm2, %v845_v5, %v916_v38  ;;  %v920_v49 = vsel %vm1409_vm2, %v862_v28, %v919_v39 }
 0x2cf   :  { %918 = vst [vmem:[%s1455_s6] sm:$0xff] %v917_v50  ;;  %921 = vst [vmem:[%s1455_s6 + $0x8] sm:$0xff] %v920_v49  ;;  %v923_v35 = vsel %vm1409_vm2, %v879_v30, %v922_v45  ;;  %v926_v53 = vsel %vm1409_vm2, %v896_v44, %v925_v26 }
 0x2d0   :  { %924 = vst [vmem:[%s1455_s6 + $0x10] sm:$0xff] %v923_v35  ;;  %927 = vst [vmem:[%s1455_s6 + $0x18] sm:$0xff] %v926_v53 }

// kernel: _lambda_.6
= control target key start
LH: loop header
LB: loop body
LE: loop exit
PB: predicated region body
PF: predicated region fallthrough
CT: control target
= control target key end

     0   :  { %vm79_vm0 = vcmask 1044480   ;;  %vm80_vm1 = vcmask 1045504   ;;  %v322_v1 = vmov 65535   ;;  %v323_v12 = vmov 0   ;;  %s405_s0 = inlined_call_operand.vmem [shape: bf16[8,27], index: 0, kind: input, shape index: {}]   ;;  %s406_s1 = inlined_call_operand.vmem [shape: bf16[27,512], index: 1, kind: input, shape index: {}]   ;;  %s407_s2 = inlined_call_operand.vmem [shape: f32[8,1], index: 2, kind: input, shape index: {}]   ;;  %s408_s3 = inlined_call_operand.vmem [shape: f32[8,1], index: 3, kind: input, shape index: {}]   ;;  %s409_s4 = inlined_call_operand.vmem [shape: f32[8,1], index: 4, kind: input, shape index: {}]   ;;  %s410_s5 = inlined_call_operand.hbm [shape: f32[8,512], index: 5, kind: output, shape index: {0}]   ;;  %s411_s6 = inlined_call_operand.vmem [shape: bf16[8,512], index: 6, kind: output, shape index: {1}]  }
   0x1   :  { %v286_v0 = vld [vmem:[%s406_s1 + $0x24] ss:$16 sps:$4 sm:$0x3f]   ;;  %v81_v2 = vsel %vm79_vm0, 4294967295, %v322_v1  ;;  %v294_v11 = vld [vmem:[%s406_s1 + $0xc] ss:$16 sps:$4 sm:$0xff]   ;;  %127 = vmatprep.mubr.bf16.mxu0 %v323_v12  ;;  %168 = vmatprep.mubr.bf16.mxu1 %v323_v12 }
   0x2   :  { %v288_v3 = vld [vmem:[%s406_s1 + $0x2c] ss:$16 sps:$4 sm:$0x3f]   ;;  %v82_v4 = vsel %vm80_vm1, %v81_v2, 0  ;;  %v292_v6 = vld [vmem:[%s406_s1 + $0x4] ss:$16 sps:$4 sm:$0xff]  }
   0x3   :  { %v290_v5 = vld [vmem:[%s406_s1 + $0x20] ss:$16 sps:$4 sm:$0x3f]   ;;  %v87_v7 = vand.u32 %v286_v0, %v82_v4  ;;  %v93_v8 = vand.u32 %v288_v3, %v82_v4  ;;  %v291_v9 = vld [vmem:[%s406_s1 + $0x28] ss:$16 sps:$4 sm:$0x3f]  }
   0x4   :  { %v84_v10 = vand.u32 %v290_v5, %v82_v4  ;;  %v90_v13 = vand.u32 %v291_v9, %v82_v4  ;;  %v33_v14 = vld [vmem:[%s407_s2] sm:$0xff] }
   0x5   :  { %107 = vmatprep.subr.bf16.mxu0 %v87_v7  ;;  %148 = vmatprep.subr.bf16.mxu1 %v93_v8 }
   0x6   :  { %12 = vsyncpa [#allocation3], 0  ;;  %108 = vmatpush1.bf16.msra.mxu0 %v84_v10  ;;  %v296_v15 = vld [vmem:[%s406_s1] ss:$16 sps:$4 sm:$0xff]   ;;  %284 = vset.pattern.permute.xlu0 %v323_v12  ;;  %v297_v16 = vld [vmem:[%s406_s1 + $0x8] ss:$16 sps:$4 sm:$0xff]  }
   0x7   :  { %149 = vmatpush1.bf16.msra.mxu1 %v90_v13  ;;  %109 = vmatprep.subr.bf16.mxu0 %v292_v6  ;;  %v24_v17 = vld [vmem:[%s405_s0] sm:$0xf]  ;;  %vm75_vm2 = vcmask 220160   ;;  %s324_s18 = smov [#allocation2]  }
   0x8   :  { %150 = vmatprep.subr.bf16.mxu1 %v294_v11  ;;  %36 = vperm.xlu0 %284, %v33_v14   ;;  %v202_v50 = vld [vmem:[%s408_s3] sm:$0xff]  ;;  %s255_s19 = sshll.u32 %s324_s18, 4  ;;  %s256_s19 = int_to_ptr.vmem [resolvable:$true] %s255_s19 }
   0x9   :  { %285 = vset.pattern.permute.xlu1 %v323_v12  ;;  %v206_v53 = vld [vmem:[%s409_s4] sm:$0xff]  ;;  %s300_s20 = scalar_lea.vmem %s256_s19, 512  ;;  %p305_p1 = scmp.lt.s32.totalorder %s256_s19, %s256_s19 }
   0xa   :  { %110 = vmatpush1.bf16.msra.mxu0 %v296_v15  ;;  %p301_p0 = scmp.ne.s32.totalorder %s256_s19, %s300_s20  ;;  %p306_p2 = scmp.lt.s32.totalorder %s300_s20, %s300_s20 }
   0xb   :  { %151 = vmatpush1.bf16.msra.mxu1 %v297_v16 }
   0xc   :  { %p307_p3 = por %p306_p2, %p305_p1 }
   0xd   :  { %275 = vmatmul.mubr.msk.bf16.vlgmr.msra.gmra.mxu0 %vm75_vm2, %v24_v17 }
   0xe   :  { %276 = vmatmul.mubr.msk.bf16.vlgmr.msra.gmra.mxu1 %vm75_vm2, %v24_v17  ;;  %p308_p4 = pnand %p307_p3, %p301_p0 }
  0x83   :  { %v37_v18 = vpop.permute.xlu0 %36 }
  0xcd   :  { %v129_v19 = vpop.f32.mrf.mxu0 }
  0xce   :  { %v130_v20 = vadd.f32 %v129_v19, %v37_v18  ;;  %v170_v21 = vpop.f32.mrf.mxu1 }
  0xcf   :  { %v171_v22 = vadd.f32 %v170_v21, %v37_v18  ;;  %v131_v23 = vpop.f32.mrf.mxu0 }
  0xd0   :  { %177 = vst [vmem:[#allocation2] sm:$0xff] %v130_v20  ;;  %v132_v24 = vadd.f32 %v131_v23, %v37_v18  ;;  %v172_v25 = vpop.f32.mrf.mxu1 }
  0xd1   :  { %179 = vst [vmem:[#allocation2 + $0x10] sm:$0xff] %v171_v22  ;;  %v173_v26 = vadd.f32 %v172_v25, %v37_v18  ;;  %v133_v27 = vpop.f32.mrf.mxu0 }
  0xd2   :  { %178 = vst [vmem:[#allocation2 + $0x8] sm:$0xff] %v132_v24  ;;  %v174_v28 = vpop.f32.mrf.mxu1  ;;  %v181_v29 = vadd.f32 %v132_v24, %v130_v20 }
  0xd3   :  { %180 = vst [vmem:[#allocation2 + $0x18] sm:$0xff] %v173_v26  ;;  %v134_v30 = vpop.f32.mrf.mxu0 }
  0xd4   :  { %v175_v31 = vpop.f32.mrf.mxu1  ;;  %v182_v32 = vadd.f32 %v181_v29, %v171_v22 }
  0xd6   :  { %v183_v33 = vadd.f32 %v182_v32, %v173_v26 }
  0xd8   :  { %184 = vadd.xlane.f32.xlu0 %v183_v33 }
 0x161   :  { %v185_v34 = vpop.xlane.xlu0 %184 }
 0x162   :  { %v187_v35 = vmul.f32 0.001953125, %v185_v34 }
 0x164   :  { %v188_v36 = vsub.f32 %v130_v20, %v187_v35  ;;  %v189_v37 = vsub.f32 %v132_v24, %v187_v35  ;;  %v190_v38 = vsub.f32 %v171_v22, %v187_v35  ;;  %v191_v39 = vsub.f32 %v173_v26, %v187_v35 }
 0x166   :  { %v192_v40 = vmul.f32 %v188_v36, %v188_v36  ;;  %v193_v41 = vmul.f32 %v189_v37, %v189_v37  ;;  %v194_v42 = vmul.f32 %v190_v38, %v190_v38  ;;  %v195_v44 = vmul.f32 %v191_v39, %v191_v39 }
 0x168   :  { %v196_v43 = vadd.f32 %v193_v41, %v192_v40 }
 0x16a   :  { %v197_v45 = vadd.f32 %v196_v43, %v194_v42 }
 0x16c   :  { %v198_v46 = vadd.f32 %v197_v45, %v195_v44 }
 0x16e   :  { %199 = vadd.xlane.f32.xlu1 %v198_v46 }
 0x1f7   :  { %v200_v47 = vpop.xlane.xlu1 %199 }
 0x1f8   :  { %v201_v48 = vmul.f32 0.001953125, %v200_v47 }
 0x1fa   :  { %v203_v49 = vadd.f32 1e-05, %v201_v48 }
 0x1fc   :  { %298 = vrsqrt.f32 %v203_v49 }
 0x209   :  { %v299_v51 = vpop.eup %298 }
 0x20a   :  { %v205_v52 = vmul.f32 %v299_v51, %v202_v50 }
 0x20c   :  { %211 = vperm.xlu1 %285, %v205_v52   ;;  %v207_v54 = vmul.f32 %v205_v52, %v187_v35 }
 0x20e   :  { %v208_v55 = vsub.f32 %v206_v53, %v207_v54 }
 0x210   :  { %220 = vperm.xlu1 %285, %v208_v55  }
 0x211   :  { %311 = shalt.err (!%p308_p4)
}
 0x212   :  { %258 = dma.vmem_to_hbm [thread:$0]  %s256_s19, 512, %s410_s5, [#allocation3]  }
 0x287   :  { %v212_v56 = vpop.permute.xlu1 %211 }
 0x288   :  { %v214_v57 = vmul.f32 %v212_v56, %v130_v20  ;;  %v215_v58 = vmul.f32 %v212_v56, %v132_v24  ;;  %v216_v59 = vmul.f32 %v212_v56, %v171_v22  ;;  %v217_v60 = vmul.f32 %v212_v56, %v173_v26 }
 0x28b   :  { %v221_v61 = vpop.permute.xlu1 %220 }
 0x28c   :  { %v223_v62 = vadd.f32 %v221_v61, %v214_v57  ;;  %v224_v63 = vadd.f32 %v221_v61, %v215_v58  ;;  %v225_v0 = vadd.f32 %v221_v61, %v216_v59  ;;  %v226_v1 = vadd.f32 %v221_v61, %v217_v60 }
 0x28e   :  { %v227_v2 = vmax.f32 %v223_v62, 0.0  ;;  %v228_v3 = vmax.f32 %v224_v63, 0.0  ;;  %v229_v4 = vmax.f32 %v225_v0, 0.0  ;;  %v230_v5 = vmax.f32 %v226_v1, 0.0 }
 0x290   :  { %v279_v6 = vpack.c.bf16 %v228_v3, %v227_v2  ;;  %v280_v7 = vpack.c.bf16 %v230_v5, %v229_v4 }
 0x292   :  { %247 = vst [vmem:[%s411_s6] sm:$0xff] %v279_v6  ;;  %248 = vst [vmem:[%s411_s6 + $0x8] sm:$0xff] %v280_v7 }
 0x293   :  { %320 = dma.done.wait [#allocation3], 512  }
 0x294   :  { %321 = vsyncadd [#allocation3], 4294966784 }
 0x295   :  { %266 = vsyncpa [#allocation3], 1 }

// kernel: _lambda_.7
= control target key start
LH: loop header
LB: loop body
LE: loop exit
PB: predicated region body
PF: predicated region fallthrough
CT: control target
= control target key end

     0   :  { %vm142_vm0 = vcmask 1043456   ;;  %v378_v2 = vmov 0   ;;  %vm138_vm1 = vcmask 588800   ;;  %s502_s1 = inlined_call_operand.vmem [shape: bf16[72,512], index: 1, kind: input, shape index: {}]   ;;  %s503_s2 = inlined_call_operand.vmem [shape: f32[8,1], index: 2, kind: input, shape index: {}]   ;;  %s504_s0 = inlined_call_operand.vmem [shape: bf16[8,72], index: 0, kind: input, shape index: {}]   ;;  %s505_s5 = inlined_call_operand.vmem [shape: f32[8,512], index: 5, kind: output, shape index: {0}]   ;;  %s506_s3 = inlined_call_operand.vmem [shape: f32[8,1], index: 3, kind: input, shape index: {}]   ;;  %s507_s4 = inlined_call_operand.vmem [shape: f32[8,1], index: 4, kind: input, shape index: {}]   ;;  %s508_s6 = inlined_call_operand.vmem [shape: bf16[8,512], index: 6, kind: output, shape index: {1}]  }
   0x1   :  { %v40_v0 = vld [vmem:[%s502_s1 + $0x80] sm:$0xff]  ;;  %v41_v1 = vld [vmem:[%s502_s1 + $0x88] sm:$0xff]  ;;  %187 = vmatprep.mubr.bf16.mxu0 %v378_v2  ;;  %228 = vmatprep.mubr.bf16.mxu1 %v378_v2 }
   0x2   :  { %v334_v3 = vcombine.high %v40_v0, %v40_v0  ;;  %v336_v4 = vcombine.high %v41_v1, %v41_v1  ;;  %v333_v5 = vcombine.low %v40_v0, %v40_v0  ;;  %v335_v6 = vcombine.low %v41_v1, %v41_v1  ;;  %v352_v7 = vld [vmem:[%s502_s1 + $0x64] ss:$16 sps:$4 sm:$0xff]   ;;  %346 = vset.pattern.permute.xlu0 %v378_v2  ;;  %v354_v8 = vld [vmem:[%s502_s1 + $0x6c] ss:$16 sps:$4 sm:$0xff]   ;;  %v356_v11 = vld [vmem:[%s502_s1 + $0x60] ss:$16 sps:$4 sm:$0xff]  }
   0x3   :  { %347 = vset.pattern.permute.xlu1 %v378_v2  ;;  %v357_v12 = vld [vmem:[%s502_s1 + $0x68] ss:$16 sps:$4 sm:$0xff]   ;;  %v358_v13 = vld [vmem:[%s502_s1 + $0x44] ss:$16 sps:$4 sm:$0xff]   ;;  %v360_v14 = vld [vmem:[%s502_s1 + $0x4c] ss:$16 sps:$4 sm:$0xff]  }
   0x4   :  { %337 = vmatprep.subr.msk.bf16.mxu0 %vm142_vm0, %v334_v3  ;;  %339 = vmatprep.subr.msk.bf16.mxu1 %vm142_vm0, %v336_v4  ;;  %v144_v9 = vsel %vm142_vm0, %v333_v5, 0  ;;  %v150_v10 = vsel %vm142_vm0, %v335_v6, 0  ;;  %v362_v15 = vld [vmem:[%s502_s1 + $0x40] ss:$16 sps:$4 sm:$0xff]   ;;  %v363_v16 = vld [vmem:[%s502_s1 + $0x48] ss:$16 sps:$4 sm:$0xff]  }
   0x5   :  { %162 = vmatpush1.bf16.msra.mxu0 %v144_v9  ;;  %203 = vmatpush1.bf16.msra.mxu1 %v150_v10  ;;  %v364_v17 = vld [vmem:[%s502_s1 + $0x24] ss:$16 sps:$4 sm:$0xff]   ;;  %v366_v18 = vld [vmem:[%s502_s1 + $0x2c] ss:$16 sps:$4 sm:$0xff]   ;;  %v368_v20 = vld [vmem:[%s502_s1 + $0x20] ss:$16 sps:$4 sm:$0xff]  }
   0x6   :  { %163 = vmatprep.subr.bf16.mxu0 %v352_v7  ;;  %204 = vmatprep.subr.bf16.mxu1 %v354_v8  ;;  %v42_v19 = vld [vmem:[%s503_s2] sm:$0xff]  ;;  %v369_v21 = vld [vmem:[%s502_s1 + $0x28] ss:$16 sps:$4 sm:$0xff]   ;;  %v372_v23 = vld [vmem:[%s502_s1 + $0xc] ss:$16 sps:$4 sm:$0xff]  }
   0x7   :  { %v370_v22 = vld [vmem:[%s502_s1 + $0x4] ss:$16 sps:$4 sm:$0xff]   ;;  %45 = vperm.xlu0 %346, %v42_v19   ;;  %v374_v24 = vld [vmem:[%s502_s1] ss:$16 sps:$4 sm:$0xff]   ;;  %v375_v25 = vld [vmem:[%s502_s1 + $0x8] ss:$16 sps:$4 sm:$0xff]  }
   0x8   :  { %v23_v26 = vld [vmem:[%s504_s0] sm:$0xf] }
   0x9   :  { %164 = vmatpush1.bf16.msra.mxu0 %v356_v11  ;;  %205 = vmatpush1.bf16.msra.mxu1 %v357_v12  ;;  %v262_v59 = vld [vmem:[%s506_s3] sm:$0xff] }
   0xa   :  { %165 = vmatprep.subr.bf16.mxu0 %v358_v13  ;;  %206 = vmatprep.subr.bf16.mxu1 %v360_v14  ;;  %v266_v62 = vld [vmem:[%s507_s4] sm:$0xff] }
   0xd   :  { %166 = vmatpush1.bf16.msra.mxu0 %v362_v15  ;;  %207 = vmatpush1.bf16.msra.mxu1 %v363_v16 }
   0xe   :  { %167 = vmatprep.subr.bf16.mxu0 %v364_v17  ;;  %208 = vmatprep.subr.bf16.mxu1 %v366_v18 }
  0x11   :  { %168 = vmatpush1.bf16.msra.mxu0 %v368_v20  ;;  %209 = vmatpush1.bf16.msra.mxu1 %v369_v21 }
  0x12   :  { %169 = vmatprep.subr.bf16.mxu0 %v370_v22  ;;  %210 = vmatprep.subr.bf16.mxu1 %v372_v23 }
  0x15   :  { %170 = vmatpush1.bf16.msra.mxu0 %v374_v24  ;;  %211 = vmatpush1.bf16.msra.mxu1 %v375_v25 }
  0x18   :  { %338 = vmatmul.mubr.msk.bf16.vlgmr.msra.gmra.mxu0 %vm138_vm1, %v23_v26  ;;  %340 = vmatmul.mubr.msk.bf16.vlgmr.msra.gmra.mxu1 %vm138_vm1, %v23_v26 }
  0x82   :  { %v46_v27 = vpop.permute.xlu0 %45 }
  0xd8   :  { %v189_v28 = vpop.f32.mrf.mxu0  ;;  %v230_v29 = vpop.f32.mrf.mxu1 }
  0xd9   :  { %v190_v30 = vadd.f32 %v189_v28, %v46_v27  ;;  %v231_v31 = vadd.f32 %v230_v29, %v46_v27 }
  0xda   :  { %v191_v32 = vpop.f32.mrf.mxu0  ;;  %v232_v33 = vpop.f32.mrf.mxu1 }
  0xdb   :  { %237 = vst [vmem:[%s505_s5] sm:$0xff] %v190_v30  ;;  %239 = vst [vmem:[%s505_s5 + $0x10] sm:$0xff] %v231_v31  ;;  %v192_v34 = vadd.f32 %v191_v32, %v46_v27  ;;  %v233_v35 = vadd.f32 %v232_v33, %v46_v27 }
  0xdc   :  { %v193_v36 = vpop.f32.mrf.mxu0  ;;  %v234_v37 = vpop.f32.mrf.mxu1 }
  0xdd   :  { %238 = vst [vmem:[%s505_s5 + $0x8] sm:$0xff] %v192_v34  ;;  %240 = vst [vmem:[%s505_s5 + $0x18] sm:$0xff] %v233_v35  ;;  %v241_v38 = vadd.f32 %v192_v34, %v190_v30 }
  0xde   :  { %v194_v39 = vpop.f32.mrf.mxu0  ;;  %v235_v40 = vpop.f32.mrf.mxu1 }
  0xdf   :  { %v242_v41 = vadd.f32 %v241_v38, %v231_v31 }
  0xe1   :  { %v243_v42 = vadd.f32 %v242_v41, %v233_v35 }
  0xe3   :  { %244 = vadd.xlane.f32.xlu0 %v243_v42 }
 0x16c   :  { %v245_v43 = vpop.xlane.xlu0 %244 }
 0x16d   :  { %v247_v44 = vmul.f32 0.001953125, %v245_v43 }
 0x16f   :  { %v248_v45 = vsub.f32 %v190_v30, %v247_v44  ;;  %v249_v46 = vsub.f32 %v192_v34, %v247_v44  ;;  %v250_v47 = vsub.f32 %v231_v31, %v247_v44  ;;  %v251_v48 = vsub.f32 %v233_v35, %v247_v44 }
 0x171   :  { %v252_v49 = vmul.f32 %v248_v45, %v248_v45  ;;  %v253_v50 = vmul.f32 %v249_v46, %v249_v46  ;;  %v254_v51 = vmul.f32 %v250_v47, %v250_v47  ;;  %v255_v53 = vmul.f32 %v251_v48, %v251_v48 }
 0x173   :  { %v256_v52 = vadd.f32 %v253_v50, %v252_v49 }
 0x175   :  { %v257_v54 = vadd.f32 %v256_v52, %v254_v51 }
 0x177   :  { %v258_v55 = vadd.f32 %v257_v54, %v255_v53 }
 0x179   :  { %259 = vadd.xlane.f32.xlu1 %v258_v55 }
 0x202   :  { %v260_v56 = vpop.xlane.xlu1 %259 }
 0x203   :  { %v261_v57 = vmul.f32 0.001953125, %v260_v56 }
 0x205   :  { %v263_v58 = vadd.f32 1e-05, %v261_v57 }
 0x207   :  { %376 = vrsqrt.f32 %v263_v58 }
 0x214   :  { %v377_v60 = vpop.eup %376 }
 0x215   :  { %v265_v61 = vmul.f32 %v377_v60, %v262_v59 }
 0x217   :  { %271 = vperm.xlu1 %347, %v265_v61   ;;  %v267_v63 = vmul.f32 %v265_v61, %v247_v44 }
 0x219   :  { %v268_v0 = vsub.f32 %v266_v62, %v267_v63 }
 0x21b   :  { %280 = vperm.xlu1 %347, %v268_v0  }
 0x292   :  { %v272_v1 = vpop.permute.xlu1 %271 }
 0x293   :  { %v274_v2 = vmul.f32 %v272_v1, %v190_v30  ;;  %v275_v3 = vmul.f32 %v272_v1, %v192_v34  ;;  %v276_v4 = vmul.f32 %v272_v1, %v231_v31  ;;  %v277_v5 = vmul.f32 %v272_v1, %v233_v35 }
 0x296   :  { %v281_v6 = vpop.permute.xlu1 %280 }
 0x297   :  { %v283_v7 = vadd.f32 %v281_v6, %v274_v2  ;;  %v284_v8 = vadd.f32 %v281_v6, %v275_v3  ;;  %v285_v9 = vadd.f32 %v281_v6, %v276_v4  ;;  %v286_v10 = vadd.f32 %v281_v6, %v277_v5 }
 0x299   :  { %v287_v11 = vmax.f32 %v283_v7, 0.0  ;;  %v288_v12 = vmax.f32 %v284_v8, 0.0  ;;  %v289_v13 = vmax.f32 %v285_v9, 0.0  ;;  %v290_v14 = vmax.f32 %v286_v10, 0.0 }
 0x29b   :  { %v343_v15 = vpack.c.bf16 %v288_v12, %v287_v11  ;;  %v344_v16 = vpack.c.bf16 %v290_v14, %v289_v13 }
 0x29d   :  { %307 = vst [vmem:[%s508_s6] sm:$0xff] %v343_v15  ;;  %308 = vst [vmem:[%s508_s6 + $0x8] sm:$0xff] %v344_v16 }

// kernel: _lambda_.8
= control target key start
LH: loop header
LB: loop body
LE: loop exit
PB: predicated region body
PF: predicated region fallthrough
CT: control target
= control target key end

     0   :  { %vm83_vm0 = vcmask 1043456   ;;  %v293_v1 = vmov 0.0   ;;  %vm294_vm1 = vmmov 0   ;;  %v295_v4 = vmov 0   ;;  %s376_s0 = inlined_call_operand.vmem [shape: bf16[16,72], index: 0, kind: input, shape index: {}]   ;;  %s377_s1 = inlined_call_operand.vmem [shape: bf16[72,128], index: 1, kind: input, shape index: {}]   ;;  %s378_s2 = inlined_call_operand.vmem [shape: f32[16,1], index: 2, kind: input, shape index: {}]   ;;  %s379_s3 = inlined_call_operand.vmem [shape: f32[16,1], index: 3, kind: input, shape index: {}]   ;;  %s380_s4 = inlined_call_operand.vmem [shape: f32[16,1], index: 4, kind: input, shape index: {}]   ;;  %s381_s5 = inlined_call_operand.hbm [shape: f32[16,128], index: 5, kind: output, shape index: {0}]   ;;  %s382_s6 = inlined_call_operand.vmem [shape: bf16[16,128], index: 6, kind: output, shape index: {1}]  }
   0x1   :  { %v261_v0 = vld [vmem:[%s377_s1 + $0x20] ss:$0 sps:$4 sm:$0xff]   ;;  %239 = vmatprep.subr.bf16.mxu0 %v293_v1  ;;  %249 = vmatprep.mubr.msk.bf16.mxu0 %vm294_vm1, %v293_v1  ;;  %v262_v3 = vld [vmem:[%s377_s1 + $0x18] sm:$0xff]  }
   0x2   :  { %v85_v2 = vsel %vm83_vm0, %v261_v0, 0  ;;  %259 = vset.pattern.permute.xlu0 %v295_v4  ;;  %260 = vset.pattern.permute.xlu1 %v295_v4  ;;  %v35_v5 = vld [vmem:[%s378_s2] sm:$0xff] }
   0x3   :  { %240 = vmatpush3.bf16.msra.mxu0 %v85_v2 }
   0x4   :  { %241 = vmatprep.subr.bf16.mxu0 %v293_v1 }
   0x5   :  { %12 = vsyncpa [#allocation3], 0  ;;  %v263_v6 = vld [vmem:[%s377_s1 + $0x10] sm:$0xff]   ;;  %39 = vperm.xlu0 %259, %v35_v5   ;;  %v36_v7 = vld [vmem:[%s378_s2 + $0x8] sm:$0xff]  ;;  %vm79_vm2 = vcmask 588800   ;;  %s296_s18 = smov [#allocation2]  }
   0x6   :  { %v264_v8 = vld [vmem:[%s377_s1 + $0x8] sm:$0xff]   ;;  %v265_v9 = vld [vmem:[%s377_s1] sm:$0xff]  }
   0x7   :  { %242 = vmatpush3.bf16.msra.mxu0 %v262_v3  ;;  %v266_v10 = vld [vmem:[%s376_s0] sm:$0xff]   ;;  %v148_v36 = vld [vmem:[%s379_s3 + $0x8] sm:$0xff] }
   0x8   :  { %243 = vmatprep.subr.bf16.mxu0 %v293_v1  ;;  %v147_v33 = vld [vmem:[%s379_s3] sm:$0xff]  ;;  %v156_v43 = vld [vmem:[%s380_s4 + $0x8] sm:$0xff]  ;;  %s202_s3 = sshll.u32 %s296_s18, 4  ;;  %s203_s3 = int_to_ptr.vmem [resolvable:$true] %s202_s3 }
   0x9   :  { %44 = vperm.xlu0 %259, %v36_v7   ;;  %v155_v40 = vld [vmem:[%s380_s4] sm:$0xff]  ;;  %s271_s19 = scalar_lea.vmem %s203_s3, 256  ;;  %p276_p1 = scmp.lt.s32.totalorder %s203_s3, %s203_s3 }
   0xa   :  { %p272_p0 = scmp.ne.s32.totalorder %s203_s3, %s271_s19  ;;  %p277_p2 = scmp.lt.s32.totalorder %s271_s19, %s271_s19 }
   0xb   :  { %244 = vmatpush3.bf16.msra.mxu0 %v263_v6 }
   0xc   :  { %245 = vmatprep.subr.bf16.mxu0 %v293_v1  ;;  %p278_p3 = por %p277_p2, %p276_p1 }
   0xe   :  { %p279_p4 = pnand %p278_p3, %p272_p0 }
   0xf   :  { %246 = vmatpush3.bf16.msra.mxu0 %v264_v8 }
  0x10   :  { %247 = vmatprep.subr.bf16.mxu0 %v293_v1 }
  0x13   :  { %248 = vmatpush3.bf16.msra.mxu0 %v265_v9 }
  0x16   :  { %250 = vmatmul.mubr.msk.bf16.vlgmr.msra.gmra.mxu0 %vm79_vm2, %v266_v10 }
  0x80   :  { %v40_v11 = vpop.permute.xlu0 %39 }
  0x84   :  { %v45_v15 = vpop.permute.xlu0 %44 }
  0xd6   :  { %v121_v12 = vpop.f32.mrf.mxu0 }
  0xd7   :  { %v122_v13 = vadd.f32 %v121_v12, %v40_v11 }
  0xd8   :  { %v251_v14 = vpop.f32.mrf.mxu0 }
  0xd9   :  { %128 = vst [vmem:[#allocation2] sm:$0xff] %v122_v13  ;;  %130 = vadd.xlane.f32.xlu1 %v122_v13 }
  0xda   :  { %v124_v16 = vpop.f32.mrf.mxu0 }
  0xdb   :  { %v125_v17 = vadd.f32 %v124_v16, %v45_v15 }
  0xdc   :  { %v252_v18 = vpop.f32.mrf.mxu0 }
  0xdd   :  { %129 = vst [vmem:[#allocation2 + $0x8] sm:$0xff] %v125_v17  ;;  %132 = vadd.xlane.f32.xlu1 %v125_v17 }
 0x162   :  { %v131_v19 = vpop.xlane.xlu1 %130 }
 0x163   :  { %v135_v20 = vmul.f32 0.0078125, %v131_v19 }
 0x165   :  { %v137_v21 = vsub.f32 %v122_v13, %v135_v20 }
 0x166   :  { %v133_v22 = vpop.xlane.xlu1 %132 }
 0x167   :  { %v136_v23 = vmul.f32 0.0078125, %v133_v22  ;;  %v139_v24 = vmul.f32 %v137_v21, %v137_v21 }
 0x169   :  { %141 = vadd.xlane.f32.xlu0 %v139_v24  ;;  %v138_v25 = vsub.f32 %v125_v17, %v136_v23 }
 0x16b   :  { %v140_v26 = vmul.f32 %v138_v25, %v138_v25 }
 0x16d   :  { %143 = vadd.xlane.f32.xlu1 %v140_v26 }
 0x1f2   :  { %v142_v27 = vpop.xlane.xlu0 %141 }
 0x1f3   :  { %v145_v28 = vmul.f32 0.0078125, %v142_v27 }
 0x1f5   :  { %v149_v29 = vadd.f32 1e-05, %v145_v28 }
 0x1f6   :  { %v144_v30 = vpop.xlane.xlu1 %143 }
 0x1f7   :  { %267 = vrsqrt.f32 %v149_v29  ;;  %v146_v31 = vmul.f32 0.0078125, %v144_v30 }
 0x1f9   :  { %v150_v32 = vadd.f32 1e-05, %v146_v31 }
 0x1fb   :  { %269 = vrsqrt.f32 %v150_v32 }
 0x204   :  { %v268_v34 = vpop.eup %267 }
 0x205   :  { %v153_v35 = vmul.f32 %v268_v34, %v147_v33 }
 0x207   :  { %163 = vperm.xlu1 %260, %v153_v35   ;;  %v157_v39 = vmul.f32 %v153_v35, %v135_v20 }
 0x208   :  { %v270_v37 = vpop.eup %269 }
 0x209   :  { %v154_v38 = vmul.f32 %v270_v37, %v148_v36  ;;  %v159_v41 = vsub.f32 %v155_v40, %v157_v39 }
 0x20b   :  { %168 = vperm.xlu1 %260, %v154_v38   ;;  %v158_v42 = vmul.f32 %v154_v38, %v136_v23 }
 0x20d   :  { %v160_v44 = vsub.f32 %v156_v43, %v158_v42 }
 0x20f   :  { %175 = vperm.xlu1 %260, %v159_v41  }
 0x213   :  { %180 = vperm.xlu1 %260, %v160_v44  }
 0x214   :  { %282 = shalt.err (!%p279_p4)
}
 0x215   :  { %s297_s20 = smov 128   ;;  %s298_s21 = smov 8  }
 0x216   :  { %208 = dma.vmem_to_hbm [thread:$0]  %s203_s3, 256, %s381_s5, [#allocation3], %s297_s20, %s297_s20, %s298_s21  }
 0x282   :  { %v164_v45 = vpop.permute.xlu1 %163 }
 0x283   :  { %v171_v48 = vmul.f32 %v164_v45, %v122_v13 }
 0x286   :  { %v169_v46 = vpop.permute.xlu1 %168 }
 0x287   :  { %v172_v49 = vmul.f32 %v169_v46, %v125_v17 }
 0x28a   :  { %v176_v47 = vpop.permute.xlu1 %175 }
 0x28b   :  { %v183_v50 = vadd.f32 %v176_v47, %v171_v48 }
 0x28d   :  { %v185_v53 = vmax.f32 %v183_v50, 0.0 }
 0x28e   :  { %v181_v51 = vpop.permute.xlu1 %180 }
 0x28f   :  { %v184_v52 = vadd.f32 %v181_v51, %v172_v49 }
 0x291   :  { %v186_v54 = vmax.f32 %v184_v52, 0.0 }
 0x293   :  { %v231_v55 = vpack.c.bf16 %v186_v54, %v185_v53 }
 0x295   :  { %232 = vst [vmem:[%s382_s6] sm:$0xff] %v231_v55  }
 0x296   :  { %291 = dma.done.wait [#allocation3], 256  }
 0x297   :  { %292 = vsyncadd [#allocation3], 4294967040 }
 0x298   :  { %216 = vsyncpa [#allocation3], 1 }

// kernel: _lambda_.9
= control target key start
LH: loop header
LB: loop body
LE: loop exit
PB: predicated region body
PF: predicated region fallthrough
CT: control target
= control target key end

     0   :  { %v187_v0 = vmov 0   ;;  %vm110_vm0 = vcmask 130048   ;;  %s253_s1 = inlined_call_operand.vmem [shape: bf16[144,128], index: 1, kind: input, shape index: {}]   ;;  %s254_s0 = inlined_call_operand.vmem [shape: bf16[16,144], index: 0, kind: input, shape index: {}]   ;;  %s255_s2 = inlined_call_operand.vmem [shape: f32[16,1], index: 2, kind: input, shape index: {}]   ;;  %s256_s3 = inlined_call_operand.vmem [shape: f32[16,128], index: 3, kind: output, shape index: {}]  }
   0x1   :  { %114 = vmatprep.subr.bf16.mxu0 %v187_v0  ;;  %v175_v1 = vld [vmem:[%s253_s1 + $0x38] sm:$0xff]   ;;  %174 = vset.pattern.permute.xlu0 %v187_v0  ;;  %v176_v2 = vld [vmem:[%s253_s1 + $0x30] sm:$0xff]   ;;  %v177_v3 = vld [vmem:[%s253_s1 + $0x28] sm:$0xff]  }
   0x2   :  { %115 = vmatpush1.bf16.msra.mxu0 %v175_v1  ;;  %v178_v4 = vld [vmem:[%s253_s1 + $0x20] sm:$0xff]   ;;  %v36_v7 = vld [vmem:[%s255_s2 + $0x8] sm:$0xff]  ;;  %v179_v8 = vld [vmem:[%s253_s1 + $0x18] sm:$0xff]  }
   0x3   :  { %116 = vmatprep.subr.bf16.mxu0 %v187_v0  ;;  %v186_v5 = vld [vmem:[%s254_s0 + $0x4] ss:$8 sps:$4 sm:$0xff]   ;;  %v180_v9 = vld [vmem:[%s253_s1 + $0x10] sm:$0xff]   ;;  %v184_v13 = vld [vmem:[%s254_s0] ss:$8 sps:$4 sm:$0xff]  }
   0x4   :  { %v35_v6 = vld [vmem:[%s255_s2] sm:$0xff]  ;;  %172 = vmatprep.mubr.msk.bf16.mxu0 %vm110_vm0, %v186_v5  ;;  %v181_v10 = vld [vmem:[%s253_s1 + $0x8] sm:$0xff]  }
   0x5   :  { %39 = vperm.xlu0 %174, %v35_v6   ;;  %v182_v11 = vld [vmem:[%s253_s1] sm:$0xff]  }
   0x6   :  { %117 = vmatpush1.bf16.msra.mxu0 %v176_v2  ;;  %v183_v12 = vld [vmem:[%s253_s1 + $0x40] sm:$0xff]  }
   0x7   :  { %118 = vmatprep.subr.bf16.mxu0 %v187_v0 }
   0x9   :  { %44 = vperm.xlu0 %174, %v36_v7  }
   0xa   :  { %119 = vmatpush1.bf16.msra.mxu0 %v177_v3 }
   0xb   :  { %120 = vmatprep.subr.bf16.mxu0 %v187_v0 }
   0xe   :  { %121 = vmatpush1.bf16.msra.mxu0 %v178_v4 }
   0xf   :  { %122 = vmatprep.subr.bf16.mxu0 %v187_v0 }
  0x12   :  { %123 = vmatpush1.bf16.msra.mxu0 %v179_v8 }
  0x13   :  { %124 = vmatprep.subr.bf16.mxu0 %v187_v0 }
  0x16   :  { %125 = vmatpush1.bf16.msra.mxu0 %v180_v9 }
  0x17   :  { %126 = vmatprep.subr.bf16.mxu0 %v187_v0 }
  0x1a   :  { %127 = vmatpush1.bf16.msra.mxu0 %v181_v10 }
  0x1b   :  { %128 = vmatprep.subr.bf16.mxu0 %v187_v0 }
  0x1e   :  { %129 = vmatpush1.bf16.msra.mxu0 %v182_v11 }
  0x1f   :  { %144 = vmatprep.subr.bf16.mxu0 %v187_v0 }
  0x22   :  { %145 = vmatpush2.bf16.msra.mxu0 %v183_v12 }
  0x25   :  { %147 = vmatmul.mubr.bf16.vlgmr.msra.gmra.mxu0 %v184_v13 }
  0x80   :  { %v40_v14 = vpop.permute.xlu0 %39 }
  0x84   :  { %v45_v18 = vpop.permute.xlu0 %44 }
  0xe5   :  { %v148_v15 = vpop.f32.mrf.mxu0 }
  0xe6   :  { %v149_v16 = vadd.f32 %v148_v15, %v40_v14 }
  0xe7   :  { %v150_v17 = vpop.f32.mrf.mxu0 }
  0xe8   :  { %155 = vst [vmem:[%s256_s3] sm:$0xff] %v149_v16 }
  0xe9   :  { %v151_v19 = vpop.f32.mrf.mxu0 }
  0xea   :  { %v152_v20 = vadd.f32 %v151_v19, %v45_v18 }
  0xeb   :  { %v153_v21 = vpop.f32.mrf.mxu0 }
  0xec   :  { %156 = vst [vmem:[%s256_s3 + $0x8] sm:$0xff] %v152_v20 }

</bundles_post_ra>
